<compile_context>
chip_gen: v6e
topology: v6e:2x2x1
jax: 0.10.0
libtpu: 0.0.40
codegen_flags: <defaults>
</compile_context>

<pallas_src>
import functools

import jax
import jax.numpy as jnp
from jax import lax
from jax.experimental import pallas as pl
from jax.experimental.pallas import tpu as pltpu

PAD = 128  # lane-dense padding target for feature / hidden / node axes


def _round_up(x, m):
    return (x + m - 1) // m * m


def _pad2d(a, rows, cols, dtype=jnp.float32):
    out = jnp.zeros((rows, cols), dtype)
    return out.at[: a.shape[0], : a.shape[1]].set(a.astype(dtype))


# ----------------------------------------------------------------------------
# Pallas kernel: one fused one-hot gather dot (MXU, bf16) + merged W1 head +
# W2 head for one 128-row batch tile.
# ----------------------------------------------------------------------------
def gnn_kernel(idx_ref, msk_ref, rhs_ref, w_ref, b_ref, out_ref):
    B = msk_ref.shape[0]          # batch-tile rows
    n_nbr = msk_ref.shape[1]      # neighbors per sample (static, small)
    NP = rhs_ref.shape[0]         # padded node count
    DP = w_ref.shape[1]           # 128 (padded feature / hidden width)

    # static slices of the packed weight / bias tables (ref slicing is free)
    w1 = w_ref[0:2 * DP, :]       # (2*DP, DP) bf16  == vstack([w1_q, w1_m])
    w2 = w_ref[2 * DP:3 * DP, :]  # (DP, DP)   bf16  (only col 0 nonzero)
    bmv = b_ref[0:1, :]           # (1, DP) f32
    b1 = b_ref[1:2, :]
    b2 = b_ref[2:3, :]

    idx = idx_ref[...]            # (B, 2 + n_nbr) int32: [query, mv, nbrs...]
    msk = msk_ref[...]            # (B, n_nbr) f32 (only used for the count)

    # --- selection matrices, built in f32 (v5e has no bf16 VPU), cast once ---
    iota = lax.broadcasted_iota(jnp.int32, (B, NP), 1)
    q_sel = (iota == idx[:, 0:1]).astype(jnp.float32)            # (B, NP)
    m_sel = (iota == idx[:, 1:2]).astype(jnp.float32)            # (B, NP)
    # masked-out neighbors were remapped (host-side) to the all-zero padded
    # row NP-1, so no per-neighbor mask multiply is needed here.
    agg_w = (iota == idx[:, 2:3]).astype(jnp.float32)
    for j in range(1, n_nbr):     # static unroll, n_nbr is small
        agg_w = agg_w + (iota == idx[:, 2 + j:3 + j]).astype(jnp.float32)
    cnt = jnp.sum(msk, axis=1, keepdims=True)                    # (B, 1)
    agg_w = agg_w * pl.reciprocal(jnp.maximum(cnt, 1.0), approx=False)

    # --- single fused gather/projection dot on the MXU -----------------------
    # rhs = concat([feats @ wmv_self, feats @ wmv_nbr], axis=1)  (host-packed)
    sel = jnp.concatenate([q_sel, m_sel, agg_w], axis=0).astype(jnp.bfloat16)
    proj = jnp.dot(sel, rhs_ref[...],
                   preferred_element_type=jnp.float32)           # (3B, 2*DP)

    agg_proj = proj[2 * B:, DP:] + bmv                           # agg @ wmv_nbr
    q_emb = proj[:B, :DP] + agg_proj                             # q @ wmv_self + ...
    m_emb = proj[B:2 * B, :DP] + agg_proj                        # m @ wmv_self + ...

    # --- head: benefit = W2(relu(W1(cat(q_emb, m_emb)))) ---------------------
    qm = jnp.concatenate([q_emb, m_emb], axis=1).astype(jnp.bfloat16)  # (B, 2*DP)
    hidden = jnp.maximum(
        jnp.dot(qm, w1, preferred_element_type=jnp.float32) + b1, 0.0)
    out_ref[...] = jnp.dot(hidden.astype(jnp.bfloat16), w2,
                           preferred_element_type=jnp.float32) + b2   # (B, DP)


# ----------------------------------------------------------------------------
# Wrapper: host-side packing (batch-independent tables, padded/bf16), index
# remap for masked neighbors, then the batched pallas_call.
# ----------------------------------------------------------------------------
def gnn_forward(query_idx, mv_idx, neighbor_idx, neighbor_mask, feats, params,
                *, b_tile=128):
    B = query_idx.shape[0]
    n_nbr = neighbor_idx.shape[1]
    num_nodes, D = feats.shape
    H = params["w1_q"].shape[1]
    assert D <= PAD and H <= PAD
    DP = PAD
    # +1 guarantees at least one all-zero padded row to park masked neighbors
    NP = _round_up(max(num_nodes + 1, 8), PAD)

    # --- batch-independent tables (precompute once per graph in production) --
    feats_f32 = feats.astype(jnp.float32)
    self_proj = feats_f32 @ params["wmv_self"]          # (num_nodes, D)
    nbr_proj = feats_f32 @ params["wmv_nbr"]            # (num_nodes, D)
    rhs = jnp.zeros((NP, 2 * DP), jnp.float32)
    rhs = rhs.at[:num_nodes, :D].set(self_proj)
    rhs = rhs.at[:num_nodes, DP:DP + D].set(nbr_proj)
    rhs = rhs.astype(jnp.bfloat16)                      # (NP, 256)

    w1 = jnp.zeros((2 * DP, DP), jnp.float32)
    w1 = w1.at[:D, :H].set(params["w1_q"])
    w1 = w1.at[DP:DP + D, :H].set(params["w1_m"])
    wpack = jnp.concatenate(
        [w1, _pad2d(params["w2"], DP, DP)], axis=0).astype(jnp.bfloat16)

    bpack = jnp.zeros((8, DP), jnp.float32)
    bpack = bpack.at[0, :D].set(params["bmv"])
    bpack = bpack.at[1, :H].set(params["b1"])
    bpack = bpack.at[2, :1].set(params["b2"])

    # --- per-batch index packing ---------------------------------------------
    nbr = jnp.where(neighbor_mask != 0, neighbor_idx, NP - 1).astype(jnp.int32)
    idx_pack = jnp.concatenate(
        [query_idx[:, None].astype(jnp.int32),
         mv_idx[:, None].astype(jnp.int32), nbr], axis=1)   # (B, 2 + n_nbr)
    msk = neighbor_mask.astype(jnp.float32)

    B_pad = _round_up(B, b_tile)
    idx_pack = _pad2d(idx_pack, B_pad, 2 + n_nbr, jnp.int32)
    msk = _pad2d(msk, B_pad, n_nbr)

    out = pl.pallas_call(
        gnn_kernel,
        out_shape=jax.ShapeDtypeStruct((B_pad, DP), jnp.float32),
        grid_spec=pltpu.PrefetchScalarGridSpec(
            num_scalar_prefetch=0,
            grid=(B_pad // b_tile,),
            in_specs=[
                pl.BlockSpec((b_tile, 2 + n_nbr), lambda b: (b, 0)),  # indices
                pl.BlockSpec((b_tile, n_nbr), lambda b: (b, 0)),      # mask
                pl.BlockSpec((NP, 2 * DP), lambda b: (0, 0)),         # gather RHS
                pl.BlockSpec((3 * DP, DP), lambda b: (0, 0)),         # weights
                pl.BlockSpec((8, DP), lambda b: (0, 0)),              # biases
            ],
            out_specs=pl.BlockSpec((b_tile, DP), lambda b: (b, 0)),
        ),
        compiler_params=pltpu.CompilerParams(
            dimension_semantics=("parallel",)),   # shard batch tiles over TCs
    )(idx_pack, msk, rhs, wpack, bpack)

    return out[:B, :1]   # (B, 1); kernel stores lane-dense (B, 128)


# ----------------------------------------------------------------------------
# Parameters: logical nn.Linear-shaped init.
# ----------------------------------------------------------------------------
def init_params(key, input_dim, hidden_dim):
    D, H = input_dim, hidden_dim
    ks = jax.random.split(key, 8)

    def u(k, shape, fan_in):
        s = 1.0 / jnp.sqrt(jnp.float32(fan_in))
        return jax.random.uniform(k, shape, jnp.float32, -s, s)

    return {
        # Wmv: Linear(2D, D) stored transposed, split into self / neighbor halves
        "wmv_self": u(ks[0], (D, D), 2 * D),
        "wmv_nbr": u(ks[1], (D, D), 2 * D),
        "bmv": u(ks[2], (D,), 2 * D),
        # W1: Linear(2D, H) split into query-emb / mv-emb halves
        "w1_q": u(ks[3], (D, H), 2 * D),
        "w1_m": u(ks[4], (D, H), 2 * D),
        "b1": u(ks[5], (H,), 2 * D),
        # W2: Linear(H, 1)
        "w2": u(ks[6], (H, 1), H),
        "b2": u(ks[7], (1,), H),
    }


# ----------------------------------------------------------------------------
# Pure-JAX reference (same approximation, f32, unpacked params) for validation.
# ----------------------------------------------------------------------------
def gnn_reference(query_idx, mv_idx, neighbor_idx, neighbor_mask, feats, p):
    dot = functools.partial(jnp.dot, precision=jax.lax.Precision.HIGHEST)
    q = feats[query_idx]                                    # (B, D)
    m = feats[mv_idx]                                       # (B, D)
    nbr = feats[neighbor_idx]                               # (B, N, D)
    msk = neighbor_mask.astype(jnp.float32)[..., None]      # (B, N, 1)
    cnt = jnp.maximum(msk.sum(axis=1), 1.0)                 # (B, 1)
    agg = (nbr * msk).sum(axis=1) / cnt                     # (B, D)
    agg_proj = dot(agg, p["wmv_nbr"]) + p["bmv"]
    q_emb = dot(q, p["wmv_self"]) + agg_proj
    m_emb = dot(m, p["wmv_self"]) + agg_proj
    hidden = jnp.maximum(
        dot(q_emb, p["w1_q"]) + dot(m_emb, p["w1_m"]) + p["b1"], 0.0)
    return dot(hidden, p["w2"]) + p["b2"]                   # (B, 1)


if __name__ == "__main__":
    INPUT_DIM = 32     # len(feats_dict['Q0'])
    HIDDEN_DIM = 32
    NUM_NODES = 64
    N_NBR = 8
    BATCH = 256        # (query, mv) pairs evaluated in one kernel launch
    # K loop iterations of the reference model rebuild their Linears each time;
    # only the last iteration reaches the head, so only it is computed.

    key = jax.random.PRNGKey(0)
    k_feat, k_param, k_q, k_mv, k_nbr, k_cnt = jax.random.split(key, 6)

    feats = jax.random.normal(k_feat, (NUM_NODES, INPUT_DIM), jnp.float32)
    query_idx = jax.random.randint(k_q, (BATCH,), 0, NUM_NODES, jnp.int32)
    mv_idx = jax.random.randint(k_mv, (BATCH,), 0, NUM_NODES, jnp.int32)
    neighbor_idx = jax.random.randint(k_nbr, (BATCH, N_NBR), 0, NUM_NODES,
                                      jnp.int32)
    n_valid = jax.random.randint(k_cnt, (BATCH, 1), 1, N_NBR + 1, jnp.int32)
    neighbor_mask = (jnp.arange(N_NBR, dtype=jnp.int32)[None, :]
                     < n_valid).astype(jnp.int32)

    params = init_params(k_param, INPUT_DIM, HIDDEN_DIM)

    benefit = gnn_forward(query_idx, mv_idx, neighbor_idx, neighbor_mask,
                          feats, params, b_tile=128)
    benefit = jax.block_until_ready(benefit)
    assert benefit.shape == (BATCH, 1) and benefit.dtype == jnp.float32

    ref = gnn_reference(query_idx, mv_idx, neighbor_idx, neighbor_mask,
                        feats, params)
    max_err = float(jnp.max(jnp.abs(benefit - ref)))
    assert jnp.allclose(benefit, ref, rtol=2e-2, atol=2e-2), max_err

    print("KERNEL_OK")
</pallas_src>

<mosaic_0001>
module attributes {stable_mosaic.version = 11 : i64} {
  func.func @gnn_kernel(%arg0: i32, %arg1: memref<128x10xi32, #tpu.memory_space<vmem>>, %arg2: memref<128x8xf32, #tpu.memory_space<vmem>>, %arg3: memref<128x256xbf16, #tpu.memory_space<vmem>>, %arg4: memref<384x128xbf16, #tpu.memory_space<vmem>>, %arg5: memref<8x128xf32, #tpu.memory_space<vmem>>, %arg6: memref<128x128xf32, #tpu.memory_space<vmem>>) attributes {dimension_semantics = [#tpu.dimension_semantics<parallel>], iteration_bounds = array<i64: 2>, scalar_prefetch = 0 : i64, scratch_operands = 0 : i64, tpu.core_type = #tpu.core_type<tc>, window_params = [{transform_indices = @transform_0, window_bounds = array<i64: 128, 10>}, {transform_indices = @transform_1, window_bounds = array<i64: 128, 8>}, {pipeline_mode = #tpu.pipeline_mode<synchronous>, transform_indices = @transform_2, window_bounds = array<i64: 128, 256>}, {pipeline_mode = #tpu.pipeline_mode<synchronous>, transform_indices = @transform_3, window_bounds = array<i64: 384, 128>}, {pipeline_mode = #tpu.pipeline_mode<synchronous>, transform_indices = @transform_4, window_bounds = array<i64: 8, 128>}, {transform_indices = @transform_5, window_bounds = array<i64: 128, 128>}]} {
    %c0 = arith.constant 0 : index
    %c0_0 = arith.constant 0 : index
    %0 = vector.load %arg4[%c0, %c0_0] : memref<384x128xbf16, #tpu.memory_space<vmem>>, vector<256x128xbf16>
    %c256 = arith.constant 256 : index
    %c0_1 = arith.constant 0 : index
    %1 = vector.load %arg4[%c256, %c0_1] : memref<384x128xbf16, #tpu.memory_space<vmem>>, vector<128x128xbf16>
    %c0_2 = arith.constant 0 : index
    %c0_3 = arith.constant 0 : index
    %2 = vector.load %arg5[%c0_2, %c0_3] : memref<8x128xf32, #tpu.memory_space<vmem>>, vector<1x128xf32>
    %c1 = arith.constant 1 : index
    %c0_4 = arith.constant 0 : index
    %3 = vector.load %arg5[%c1, %c0_4] : memref<8x128xf32, #tpu.memory_space<vmem>>, vector<1x128xf32>
    %c2 = arith.constant 2 : index
    %c0_5 = arith.constant 0 : index
    %4 = vector.load %arg5[%c2, %c0_5] : memref<8x128xf32, #tpu.memory_space<vmem>>, vector<1x128xf32>
    %c0_6 = arith.constant 0 : index
    %c0_7 = arith.constant 0 : index
    %5 = vector.load %arg1[%c0_6, %c0_7] : memref<128x10xi32, #tpu.memory_space<vmem>>, vector<128x10xi32>
    %c0_8 = arith.constant 0 : index
    %c0_9 = arith.constant 0 : index
    %6 = vector.load %arg2[%c0_8, %c0_9] : memref<128x8xf32, #tpu.memory_space<vmem>>, vector<128x8xf32>
    %7 = tpu.iota {dimensions = array<i32: 1>} : vector<128x128xi32>
    %8 = vector.extract_strided_slice %5 {offsets = [0, 0], sizes = [128, 1], strides = [1, 1]} : vector<128x10xi32> to vector<128x1xi32>
    %9 = vector.broadcast %8 : vector<128x1xi32> to vector<128x128xi32>
    %10 = arith.cmpi eq, %7, %9 : vector<128x128xi32>
    %11 = arith.extui %10 : vector<128x128xi1> to vector<128x128xi32>
    %12 = arith.sitofp %11 : vector<128x128xi32> to vector<128x128xf32>
    %13 = vector.extract_strided_slice %5 {offsets = [0, 1], sizes = [128, 1], strides = [1, 1]} : vector<128x10xi32> to vector<128x1xi32>
    %14 = vector.broadcast %13 : vector<128x1xi32> to vector<128x128xi32>
    %15 = arith.cmpi eq, %7, %14 : vector<128x128xi32>
    %16 = arith.extui %15 : vector<128x128xi1> to vector<128x128xi32>
    %17 = arith.sitofp %16 : vector<128x128xi32> to vector<128x128xf32>
    %18 = vector.extract_strided_slice %5 {offsets = [0, 2], sizes = [128, 1], strides = [1, 1]} : vector<128x10xi32> to vector<128x1xi32>
    %19 = vector.broadcast %18 : vector<128x1xi32> to vector<128x128xi32>
    %20 = arith.cmpi eq, %7, %19 : vector<128x128xi32>
    %21 = arith.extui %20 : vector<128x128xi1> to vector<128x128xi32>
    %22 = arith.sitofp %21 : vector<128x128xi32> to vector<128x128xf32>
    %23 = vector.extract_strided_slice %5 {offsets = [0, 3], sizes = [128, 1], strides = [1, 1]} : vector<128x10xi32> to vector<128x1xi32>
    %24 = vector.broadcast %23 : vector<128x1xi32> to vector<128x128xi32>
    %25 = arith.cmpi eq, %7, %24 : vector<128x128xi32>
    %26 = arith.extui %25 : vector<128x128xi1> to vector<128x128xi32>
    %27 = arith.sitofp %26 : vector<128x128xi32> to vector<128x128xf32>
    %28 = arith.addf %22, %27 : vector<128x128xf32>
    %29 = vector.extract_strided_slice %5 {offsets = [0, 4], sizes = [128, 1], strides = [1, 1]} : vector<128x10xi32> to vector<128x1xi32>
    %30 = vector.broadcast %29 : vector<128x1xi32> to vector<128x128xi32>
    %31 = arith.cmpi eq, %7, %30 : vector<128x128xi32>
    %32 = arith.extui %31 : vector<128x128xi1> to vector<128x128xi32>
    %33 = arith.sitofp %32 : vector<128x128xi32> to vector<128x128xf32>
    %34 = arith.addf %28, %33 : vector<128x128xf32>
    %35 = vector.extract_strided_slice %5 {offsets = [0, 5], sizes = [128, 1], strides = [1, 1]} : vector<128x10xi32> to vector<128x1xi32>
    %36 = vector.broadcast %35 : vector<128x1xi32> to vector<128x128xi32>
    %37 = arith.cmpi eq, %7, %36 : vector<128x128xi32>
    %38 = arith.extui %37 : vector<128x128xi1> to vector<128x128xi32>
    %39 = arith.sitofp %38 : vector<128x128xi32> to vector<128x128xf32>
    %40 = arith.addf %34, %39 : vector<128x128xf32>
    %41 = vector.extract_strided_slice %5 {offsets = [0, 6], sizes = [128, 1], strides = [1, 1]} : vector<128x10xi32> to vector<128x1xi32>
    %42 = vector.broadcast %41 : vector<128x1xi32> to vector<128x128xi32>
    %43 = arith.cmpi eq, %7, %42 : vector<128x128xi32>
    %44 = arith.extui %43 : vector<128x128xi1> to vector<128x128xi32>
    %45 = arith.sitofp %44 : vector<128x128xi32> to vector<128x128xf32>
    %46 = arith.addf %40, %45 : vector<128x128xf32>
    %47 = vector.extract_strided_slice %5 {offsets = [0, 7], sizes = [128, 1], strides = [1, 1]} : vector<128x10xi32> to vector<128x1xi32>
    %48 = vector.broadcast %47 : vector<128x1xi32> to vector<128x128xi32>
    %49 = arith.cmpi eq, %7, %48 : vector<128x128xi32>
    %50 = arith.extui %49 : vector<128x128xi1> to vector<128x128xi32>
    %51 = arith.sitofp %50 : vector<128x128xi32> to vector<128x128xf32>
    %52 = arith.addf %46, %51 : vector<128x128xf32>
    %53 = vector.extract_strided_slice %5 {offsets = [0, 8], sizes = [128, 1], strides = [1, 1]} : vector<128x10xi32> to vector<128x1xi32>
    %54 = vector.broadcast %53 : vector<128x1xi32> to vector<128x128xi32>
    %55 = arith.cmpi eq, %7, %54 : vector<128x128xi32>
    %56 = arith.extui %55 : vector<128x128xi1> to vector<128x128xi32>
    %57 = arith.sitofp %56 : vector<128x128xi32> to vector<128x128xf32>
    %58 = arith.addf %52, %57 : vector<128x128xf32>
    %59 = vector.extract_strided_slice %5 {offsets = [0, 9], sizes = [128, 1], strides = [1, 1]} : vector<128x10xi32> to vector<128x1xi32>
    %60 = vector.broadcast %59 : vector<128x1xi32> to vector<128x128xi32>
    %61 = arith.cmpi eq, %7, %60 : vector<128x128xi32>
    %62 = arith.extui %61 : vector<128x128xi1> to vector<128x128xi32>
    %63 = arith.sitofp %62 : vector<128x128xi32> to vector<128x128xf32>
    %64 = arith.addf %58, %63 : vector<128x128xf32>
    %cst = arith.constant dense<0.000000e+00> : vector<128xf32>
    %65 = vector.multi_reduction <add>, %6, %cst [1] : vector<128x8xf32> to vector<128xf32>
    %66 = vector.shape_cast %65 : vector<128xf32> to vector<128x1xf32>
    %cst_10 = arith.constant 1.000000e+00 : f32
    %67 = vector.broadcast %cst_10 : f32 to vector<128x1xf32>
    %68 = arith.maximumf %66, %67 : vector<128x1xf32>
    %69 = tpu.reciprocal %68 : vector<128x1xf32> -> vector<128x1xf32>
    %70 = vector.broadcast %69 : vector<128x1xf32> to vector<128x128xf32>
    %71 = arith.mulf %64, %70 : vector<128x128xf32>
    %72 = tpu.concatenate %12, %17, %71 in 0 : vector<128x128xf32>, vector<128x128xf32>, vector<128x128xf32> -> vector<384x128xf32>
    %73 = arith.truncf %72 : vector<384x128xf32> to vector<384x128xbf16>
    %c0_11 = arith.constant 0 : index
    %c0_12 = arith.constant 0 : index
    %74 = vector.load %arg3[%c0_11, %c0_12] : memref<128x256xbf16, #tpu.memory_space<vmem>>, vector<128x256xbf16>
    %cst_13 = arith.constant dense<0.000000e+00> : vector<384x256xf32>
    %75 = tpu.matmul %73, %74, %cst_13 {dimension_numbers = #tpu.dot_dimension_numbers<[1], [0], [0], [1], [0, 0, 1, 1], [], []>} : vector<384x128xbf16>, vector<128x256xbf16>, vector<384x256xf32> -> vector<384x256xf32>
    %76 = vector.extract_strided_slice %75 {offsets = [256, 128], sizes = [128, 128], strides = [1, 1]} : vector<384x256xf32> to vector<128x128xf32>
    %77 = vector.broadcast %2 : vector<1x128xf32> to vector<128x128xf32>
    %78 = arith.addf %76, %77 : vector<128x128xf32>
    %79 = vector.extract_strided_slice %75 {offsets = [0, 0], sizes = [128, 128], strides = [1, 1]} : vector<384x256xf32> to vector<128x128xf32>
    %80 = arith.addf %79, %78 : vector<128x128xf32>
    %81 = vector.extract_strided_slice %75 {offsets = [128, 0], sizes = [128, 128], strides = [1, 1]} : vector<384x256xf32> to vector<128x128xf32>
    %82 = arith.addf %81, %78 : vector<128x128xf32>
    %83 = tpu.concatenate %80, %82 in 1 : vector<128x128xf32>, vector<128x128xf32> -> vector<128x256xf32>
    %84 = arith.truncf %83 : vector<128x256xf32> to vector<128x256xbf16>
    %cst_14 = arith.constant dense<0.000000e+00> : vector<128x128xf32>
    %85 = tpu.matmul %84, %0, %cst_14 {dimension_numbers = #tpu.dot_dimension_numbers<[1], [0], [0], [1], [0, 0, 1, 1], [], []>} : vector<128x256xbf16>, vector<256x128xbf16>, vector<128x128xf32> -> vector<128x128xf32>
    %86 = vector.broadcast %3 : vector<1x128xf32> to vector<128x128xf32>
    %87 = arith.addf %85, %86 : vector<128x128xf32>
    %cst_15 = arith.constant 0.000000e+00 : f32
    %88 = vector.broadcast %cst_15 : f32 to vector<128x128xf32>
    %89 = arith.maximumf %87, %88 : vector<128x128xf32>
    %90 = arith.truncf %89 : vector<128x128xf32> to vector<128x128xbf16>
    %cst_16 = arith.constant dense<0.000000e+00> : vector<128x128xf32>
    %91 = tpu.matmul %90, %1, %cst_16 {dimension_numbers = #tpu.dot_dimension_numbers<[1], [0], [0], [1], [0, 0, 1, 1], [], []>} : vector<128x128xbf16>, vector<128x128xbf16>, vector<128x128xf32> -> vector<128x128xf32>
    %92 = vector.broadcast %4 : vector<1x128xf32> to vector<128x128xf32>
    %93 = arith.addf %91, %92 : vector<128x128xf32>
    %c0_17 = arith.constant 0 : index
    %c0_18 = arith.constant 0 : index
    %94 = vector.load %arg6[%c0_17, %c0_18] : memref<128x128xf32, #tpu.memory_space<vmem>>, vector<128x128xf32>
    tpu.vector_store %arg6[%c0_17, %c0_18], %93 {strides = array<i32>} : memref<128x128xf32, #tpu.memory_space<vmem>>, vector<128x128xf32>,
    return
  }
  func.func @transform_0(%arg0: i32) -> (i32, i32) {
    %c0_i32 = arith.constant 0 : i32
    %c0_i32_0 = arith.constant 0 : i32
    return %arg0, %c0_i32 : i32, i32
  }
  func.func @transform_1(%arg0: i32) -> (i32, i32) {
    %c0_i32 = arith.constant 0 : i32
    %c0_i32_0 = arith.constant 0 : i32
    return %arg0, %c0_i32 : i32, i32
  }
  func.func @transform_2(%arg0: i32) -> (i32, i32) {
    %c0_i32 = arith.constant 0 : i32
    %c0_i32_0 = arith.constant 0 : i32
    %c0_i32_1 = arith.constant 0 : i32
    return %c0_i32, %c0_i32_0 : i32, i32
  }
  func.func @transform_3(%arg0: i32) -> (i32, i32) {
    %c0_i32 = arith.constant 0 : i32
    %c0_i32_0 = arith.constant 0 : i32
    %c0_i32_1 = arith.constant 0 : i32
    return %c0_i32, %c0_i32_0 : i32, i32
  }
  func.func @transform_4(%arg0: i32) -> (i32, i32) {
    %c0_i32 = arith.constant 0 : i32
    %c0_i32_0 = arith.constant 0 : i32
    %c0_i32_1 = arith.constant 0 : i32
    return %c0_i32, %c0_i32_0 : i32, i32
  }
  func.func @transform_5(%arg0: i32) -> (i32, i32) {
    %c0_i32 = arith.constant 0 : i32
    %c0_i32_0 = arith.constant 0 : i32
    return %arg0, %c0_i32 : i32, i32
  }
}

</mosaic_0001>

<bundles_post_ra>
// kernel: tpu_custom_call.1
= control target key start
LH: loop header
LB: loop body
LE: loop exit
PB: predicated region body
PF: predicated region fallthrough
CT: control target
= control target key end

     0   :  { %10 = vsyncpa [#allocation3], 0  ;;  %s4608_s0 = inlined_call_operand.vmem [shape: s32[256,10], index: 0, kind: input, shape index: {}]   ;;  %s4609_s1 = inlined_call_operand.vmem [shape: f32[256,8], index: 1, kind: input, shape index: {}]   ;;  %s4610_s2 = inlined_call_operand.vmem [shape: bf16[128,256], index: 2, kind: input, shape index: {}]   ;;  %s4611_s3 = inlined_call_operand.vmem [shape: bf16[384,128], index: 3, kind: input, shape index: {}]   ;;  %s4612_s4 = inlined_call_operand.vmem [shape: f32[8,128], index: 4, kind: input, shape index: {}]   ;;  %s4613_s5 = inlined_call_operand.hbm [shape: f32[256,128], index: 5, kind: output, shape index: {}]  }
   0x1   :  { %12 = vsyncpa [#allocation3 + $0x1], 0  ;;  %s3083_s18 = smov 0   ;;  %s3085_s19 = smov 0  }
   0x2   :  { %s3087_s20 = smov 0   ;;  %s3089_s21 = smov 0  }
   0x3 LB: > { %s3104_s22 = sadd.s32 4294967295, %s3036_s21   ;;  %s2390_s23 = sadd.s32 4294967294, %s3036_s21   ;;  %s3036_s21 = sphi %s3089_s21, %s4820_s21   ;;  %s3032_s20 = sphi %s3087_s20, %s4819_s20   ;;  %s3028_s19 = sphi %s3085_s19, %s4818_s19   ;;  %s3024_s18 = sphi %s3083_s18, %s4817_s18  }
   0x4   : > { %s3108_s24 = sadd.s32 1, %s3036_s21   ;;  %s140_s25 = sadd.s32 1, %s3032_s20 }
   0x5   : > { %s137_s26 = ssub.s32 %s3036_s21, %s3108_s24  ;;  %p150_p0 = scmp.ne.s32.totalorder %s3032_s20, %s3028_s19 }
   0x6   : > { %p138_p1 = scmp.eq.s32.totalorder %s137_s26, 0  ;;  %p151_p2 = scmp.eq.s32.totalorder %s3104_s22, 1 }
   0x7   : > { %p156_p3 = scmp.ne.s32.totalorder %s3028_s19, %s3024_s18  ;;  %p157_p4 = scmp.eq.s32.totalorder %s2390_s23, 1 }
   0x8   : > { %s3119_s27 = scalar_select %p138_p1, %s3032_s20, %s140_s25  }
   0x9   : > { %p3121_p5 = por %p151_p2, %p150_p0  ;;  %p3125_p6 = por %p157_p4, %p156_p3 }
   0xa   : > { %p2393_p7 = scmp.ge.s32.totalorder %s3036_s21, 1  ;;  %p202_p8 = scmp.lt.s32.totalorder %s3036_s21, 3 }
   0xc   : > { %p203_p9 = pnand %p2393_p7, %p202_p8 }
   0xe   : > { %206 = sbr.rel (%p203_p9) target bundleno = 1664 (0x680), region = 40 }
  0x13   : > { %s2395_s30 = sshll.u32 %s3104_s22, 4  ;;  %v4614_v0 = vmov 0   ;;  %v2881_v1 = vld [vmem:[%s4610_s2 + $0x74] ss:$8 sps:$4 sm:$0xff]   ;;  %v2883_v2 = vld [vmem:[%s4610_s2 + $0x70] ss:$8 sps:$4 sm:$0xff]   ;;  %v332_v47 = vlaneseq }
  0x14   : > { %2822 = vset.pattern.permute.xlu1 %v4614_v0  ;;  %2821 = vset.pattern.permute.xlu0 %v4614_v0  ;;  %p236_p10 = scmp.lt.s32.totalorder %s2395_s30, 31  ;;  %v2884_v3 = vld [vmem:[%s4610_s2 + $0x64] ss:$8 sps:$4 sm:$0xff]   ;;  %v2886_v4 = vld [vmem:[%s4610_s2 + $0x60] ss:$8 sps:$4 sm:$0xff]   ;;  %v4626_v33 = vmov 3  }
  0x15   : > { %1655 = vmatprep.mubr.bf16.mxu0 %v4614_v0  ;;  %1799 = vmatprep.mubr.bf16.mxu1 %v4614_v0  ;;  %v2887_v5 = vld [vmem:[%s4610_s2 + $0x54] ss:$8 sps:$4 sm:$0xff]   ;;  %v2889_v10 = vld [vmem:[%s4610_s2 + $0x50] ss:$8 sps:$4 sm:$0xff]   ;;  %v2890_v11 = vld [vmem:[%s4610_s2 + $0x44] ss:$8 sps:$4 sm:$0xff]  }
  0x16   : > { %s4822_s30 = smov (!%p236_p10, %s2395_s30), 31  ;;  %1623 = vmatprep.subr.bf16.mxu0 %v2881_v1  ;;  %2752 = vmatprep.subr.bf16.mxu1 %v2881_v1  ;;  %v2892_v14 = vld [vmem:[%s4610_s2 + $0x40] ss:$8 sps:$4 sm:$0xff]   ;;  %v2893_v15 = vld [vmem:[%s4610_s2 + $0x34] ss:$8 sps:$4 sm:$0xff]   ;;  %v3040_v34 = vmov 1  }
  0x17   : > { %1624 = vmatpush1.bf16.msra.mxu0 %v2883_v2  ;;  %2760 = vmatpush1.bf16.msra.mxu1 %v2883_v2  ;;  %s2396_s12 = sshll.u32 %s4822_s30, 3  ;;  %v2895_v18 = vld [vmem:[%s4610_s2 + $0x30] ss:$8 sps:$4 sm:$0xff]   ;;  %v2896_v19 = vld [vmem:[%s4610_s2 + $0x24] ss:$8 sps:$4 sm:$0xff]   ;;  %vm1406_vm0 = vcmask 64512  }
  0x18   : > { %1625 = vmatprep.subr.bf16.mxu0 %v2884_v3  ;;  %2753 = vmatprep.subr.bf16.mxu1 %v2884_v3  ;;  %s3156_s17 = scalar_lea.vmem %s4608_s0, %s2396_s12  ;;  %v2898_v22 = vld [vmem:[%s4610_s2 + $0x20] ss:$8 sps:$4 sm:$0xff]   ;;  %v2899_v23 = vld [vmem:[%s4610_s2 + $0x14] ss:$8 sps:$4 sm:$0xff]   ;;  %v2901_v26 = vld [vmem:[%s4610_s2 + $0x10] ss:$8 sps:$4 sm:$0xff]   ;;  %s3265_s23 = scalar_lea.vmem %s4609_s1, %s2396_s12 }
  0x19   : > { %v3162_v6 = vld [vmem:[%s3156_s17 + $0x10] sm:$0xff]  ;;  %v3165_v7 = vld [vmem:[%s3156_s17] sm:$0xff]  ;;  %v3170_v8 = vld [vmem:[%s3156_s17 + $0x18] sm:$0xff]  ;;  %v4622_v43 = vmov 2   ;;  %v4624_v46 = vmov 5   ;;  %v3290_v49 = vand.u32 127, %v332_v47 }
  0x1a   : > { %341 = vperm.xlu1 %2822, %v3162_v6   ;;  %335 = vperm.xlu0 %2821, %v3165_v7   ;;  %v3173_v9 = vld [vmem:[%s3156_s17 + $0x8] sm:$0xff]  ;;  %v3187_v13 = vld [vmem:[%s3156_s17 + $0x20] sm:$0xff]  ;;  %v3198_v16 = vld [vmem:[%s3156_s17 + $0x38] sm:$0xff]  ;;  %v4630_v51 = vmov 7   ;;  %v3044_v53 = vmov 1.0|1.0  }
  0x1b   : > { %1626 = vmatpush1.bf16.msra.mxu0 %v2886_v4  ;;  %2761 = vmatpush1.bf16.msra.mxu1 %v2886_v4  ;;  %v3184_v12 = vld [vmem:[%s3156_s17 + $0x28] sm:$0xff]  ;;  %v3201_v17 = vld [vmem:[%s3156_s17 + $0x30] sm:$0xff]  ;;  %v3213_v21 = vld [vmem:[%s3156_s17 + $0x40] sm:$0xff]  ;;  %s232_s26 = sand.u32 1, %s3028_s19   ;;  %s2639_s10 = sshll.u32 %s3104_s22, 11 }
  0x1c   : > { %1627 = vmatprep.subr.bf16.mxu0 %v2887_v5  ;;  %2754 = vmatprep.subr.bf16.mxu1 %v2887_v5  ;;  %v3210_v20 = vld [vmem:[%s3156_s17 + $0x48] sm:$0xff]  ;;  %v3224_v24 = vld [vmem:[%s3156_s17 + $0x58] sm:$0xff]  ;;  %v3227_v25 = vld [vmem:[%s3156_s17 + $0x50] sm:$0xff]  ;;  %s2394_s6 = sshll.u32 %s232_s26, 7  ;;  %s4560_s15 = scalar_lea.hbm %s4613_s5, %s2639_s10 }
  0x1d   : > { %v2902_v27 = vld [vmem:[%s4610_s2 + $0x4] ss:$8 sps:$4 sm:$0xff]   ;;  %v2904_v30 = vld [vmem:[%s4610_s2] ss:$8 sps:$4 sm:$0xff]   ;;  %v3251_v31 = vld [vmem:[%s3156_s17 + $0x78] sm:$0xff]  ;;  %s4539_s9 = scalar_lea.vmem [#allocation2], %s2394_s6 }
  0x1e   : > { %344 = vperm.xlu1 %2822, %v3170_v8   ;;  %338 = vperm.xlu0 %2821, %v3173_v9   ;;  %v3238_v28 = vld [vmem:[%s3156_s17 + $0x68] sm:$0xff]  ;;  %v3241_v29 = vld [vmem:[%s3156_s17 + $0x60] sm:$0xff]  ;;  %v3254_v32 = vld [vmem:[%s3156_s17 + $0x70] sm:$0xff]  ;;  %s2316_s11 = sshll.u32 %s4539_s9, 4  ;;  %s4568_s22 = scalar_lea.sflag [#allocation3], %s232_s26  ;;  %s4562_s11 = int_to_ptr.vmem [resolvable:$true] %s2316_s11 }
  0x1f   : > { %1628 = vmatpush1.bf16.msra.mxu0 %v2889_v10  ;;  %2762 = vmatpush1.bf16.msra.mxu1 %v2889_v10  ;;  %v317_v35 = vld [vmem:[%s3265_s23 + $0x8] sm:$0xff]  ;;  %v318_v37 = vld [vmem:[%s3265_s23 + $0x10] sm:$0xff]  ;;  %v316_v38 = vld [vmem:[%s3265_s23] sm:$0xff]  ;;  %s2976_s16 = scalar_lea.vmem %s4562_s11, 2048 }
  0x20   : > { %1629 = vmatprep.subr.bf16.mxu0 %v2890_v11  ;;  %2755 = vmatprep.subr.bf16.mxu1 %v2890_v11  ;;  %v1410_v36 = vsel %vm1406_vm0, %v317_v35, 0.0  ;;  %v1413_v39 = vsel %vm1406_vm0, %v318_v37, 0.0  ;;  %v1407_v40 = vsel %vm1406_vm0, %v316_v38, 0.0  ;;  %v320_v41 = vld [vmem:[%s3265_s23 + $0x20] sm:$0xff]  ;;  %v319_v44 = vld [vmem:[%s3265_s23 + $0x18] sm:$0xff]  ;;  %v325_v61 = vld [vmem:[%s3265_s23 + $0x48] sm:$0xff]  ;;  %p2977_p11 = scmp.ne.s32.totalorder %s4562_s11, %s2976_s16 }
  0x21   : > { %v1419_v42 = vsel %vm1406_vm0, %v320_v41, 0.0  ;;  %v1416_v45 = vsel %vm1406_vm0, %v319_v44, 0.0  ;;  %v323_v57 = vld [vmem:[%s3265_s23 + $0x38] sm:$0xff]  ;;  %v1434_v62 = vsel %vm1406_vm0, %v325_v61, 0.0  ;;  %v322_v35 = vld [vmem:[%s3265_s23 + $0x30] sm:$0xff] }
  0x22   : > { %350 = vperm.xlu1 %2822, %v3184_v12   ;;  %347 = vperm.xlu0 %2821, %v3187_v13   ;;  %v1428_v60 = vsel %vm1406_vm0, %v323_v57, 0.0  ;;  %v1425_v37 = vsel %vm1406_vm0, %v322_v35, 0.0  ;;  %v4616_v35 = vmov 4   ;;  %p2978_p12 = pnand %p2977_p11, %p3121_p5 }
  0x23   : > { %1630 = vmatpush1.bf16.msra.mxu0 %v2892_v14  ;;  %2763 = vmatpush1.bf16.msra.mxu1 %v2892_v14  ;;  %v321_v14 = vld [vmem:[%s3265_s23 + $0x28] sm:$0xff] }
  0x24   : > { %1631 = vmatprep.subr.bf16.mxu0 %v2893_v15  ;;  %2756 = vmatprep.subr.bf16.mxu1 %v2893_v15  ;;  %v1422_v15 = vsel %vm1406_vm0, %v321_v14, 0.0  ;;  %p2979_p13 = pneg %p2978_p12 }
  0x26   : > { %356 = vperm.xlu1 %2822, %v3198_v16   ;;  %353 = vperm.xlu0 %2821, %v3201_v17  }
  0x27   : > { %1632 = vmatpush1.bf16.msra.mxu0 %v2895_v18  ;;  %2764 = vmatpush1.bf16.msra.mxu1 %v2895_v18  ;;  %v327_v18 = vld [vmem:[%s3265_s23 + $0x58] sm:$0xff] }
  0x28   : > { %1633 = vmatprep.subr.bf16.mxu0 %v2896_v19  ;;  %2757 = vmatprep.subr.bf16.mxu1 %v2896_v19  ;;  %v1440_v19 = vsel %vm1406_vm0, %v327_v18, 0.0 }
  0x2a   : > { %362 = vperm.xlu1 %2822, %v3210_v20   ;;  %359 = vperm.xlu0 %2821, %v3213_v21  }
  0x2b   : > { %1634 = vmatpush1.bf16.msra.mxu0 %v2898_v22  ;;  %2765 = vmatpush1.bf16.msra.mxu1 %v2898_v22  ;;  %v328_v22 = vld [vmem:[%s3265_s23 + $0x60] sm:$0xff] }
  0x2c   : > { %1635 = vmatprep.subr.bf16.mxu0 %v2899_v23  ;;  %2758 = vmatprep.subr.bf16.mxu1 %v2899_v23  ;;  %v1443_v23 = vsel %vm1406_vm0, %v328_v22, 0.0 }
  0x2e   : > { %368 = vperm.xlu1 %2822, %v3224_v24   ;;  %365 = vperm.xlu0 %2821, %v3227_v25  }
  0x2f   : > { %1636 = vmatpush1.bf16.msra.mxu0 %v2901_v26  ;;  %2766 = vmatpush1.bf16.msra.mxu1 %v2901_v26  ;;  %v4618_v26 = vmov 6  }
  0x30   : > { %1637 = vmatprep.subr.bf16.mxu0 %v2902_v27  ;;  %2759 = vmatprep.subr.bf16.mxu1 %v2902_v27 }
  0x32   : > { %374 = vperm.xlu1 %2822, %v3238_v28   ;;  %371 = vperm.xlu0 %2821, %v3241_v29  }
  0x33   : > { %1638 = vmatpush1.bf16.msra.mxu0 %v2904_v30  ;;  %2767 = vmatpush1.bf16.msra.mxu1 %v2904_v30 }
  0x36   : > { %380 = vperm.xlu1 %2822, %v3251_v31   ;;  %377 = vperm.xlu0 %2821, %v3254_v32  }
  0x3a   : > { %2823 = vset.pattern.permute.xlu1 %v4626_v33  ;;  %2827 = vset.pattern.permute.xlu0 %v3040_v34 }
  0x55   : > { %1411 = vadd.xlane.f32.xlu0 %v1410_v36 }
  0x59   : > { %1414 = vadd.xlane.f32.xlu0 %v1413_v39 }
  0x5a   : > { %1408 = vadd.xlane.f32.xlu1 %v1407_v40 }
  0x5d   : > { %1420 = vadd.xlane.f32.xlu0 %v1419_v42 }
  0x6b   : > { %623 = vperm.xlu1 %2823, %v3165_v7  }
  0x6f   : > { %626 = vperm.xlu1 %2823, %v3173_v9  }
  0x73   : > { %431 = vperm.xlu0 %2827, %v3165_v7   ;;  %2824 = vset.pattern.permute.xlu1 %v4622_v43 }
  0x77   : > { %440 = vperm.xlu0 %2827, %v3170_v8  }
  0x7b   : > { %446 = vperm.xlu0 %2827, %v3184_v12  }
  0x7f   : > { %452 = vperm.xlu0 %2827, %v3198_v16  }
  0x83   : > { %458 = vperm.xlu0 %2827, %v3210_v20  }
  0x87   : > { %461 = vperm.xlu0 %2827, %v3227_v25  }
  0x8b   : > { %467 = vperm.xlu0 %2827, %v3241_v29  }
  0x8f   : > { %473 = vperm.xlu0 %2827, %v3254_v32  }
  0x93   : > { %1417 = vadd.xlane.f32.xlu1 %v1416_v45  ;;  %2829 = vset.pattern.permute.xlu0 %v4624_v46 }
  0x94   : > { %856 = vperm.xlu0 %2829, %v3170_v8  }
  0x95   : > { %v336_v48 = vpop.permute.xlu0 %335  ;;  %v342_v50 = vpop.permute.xlu1 %341 }
  0x96   : > { %vm382_vm1 = vcmp.eq.s32.totalorder %v3290_v49, %v336_v48  ;;  %vm384_vm5 = vcmp.eq.s32.totalorder %v3290_v49, %v342_v50 }
  0x98   : > { %2838 = vset.pattern.permute.xlu0 %v4630_v51 }
  0x99   : > { %v339_v52 = vpop.permute.xlu0 %338  ;;  %v345_v54 = vpop.permute.xlu1 %344 }
  0x9a   : > { %vm383_vm2 = vcmp.eq.s32.totalorder %v3290_v49, %v339_v52  ;;  %vm385_vm4 = vcmp.eq.s32.totalorder %v3290_v49, %v345_v54 }
  0x9b   : > { %vm2575_vm3 = vmpackc.low %vm383_vm2, %vm382_vm1 }
  0x9c   : > { %2576 = vmatmul.mubr.msk.bf16.vlgmr.msra.gmra.mxu0 %vm2575_vm3, %v3044_v53  ;;  %vm2577_vm6 = vmpackc.low %vm385_vm4, %vm384_vm5 }
  0x9d   : > { %1663 = vmatprep.mubr.bf16.mxu0 %v4614_v0  ;;  %v351_v55 = vpop.permute.xlu1 %350  ;;  %v348_v56 = vpop.permute.xlu0 %347 }
  0x9e   : > { %vm387_vm7 = vcmp.eq.s32.totalorder %v3290_v49, %v351_v55  ;;  %vm386_vm8 = vcmp.eq.s32.totalorder %v3290_v49, %v348_v56 }
  0x9f   : > { %vm2579_vm9 = vmpackc.low %vm387_vm7, %vm386_vm8 }
  0xa1   : > { %v357_v58 = vpop.permute.xlu1 %356  ;;  %v354_v59 = vpop.permute.xlu0 %353 }
  0xa2   : > { %vm389_vm10 = vcmp.eq.s32.totalorder %v3290_v49, %v357_v58  ;;  %vm388_vm11 = vcmp.eq.s32.totalorder %v3290_v49, %v354_v59 }
  0xa3   : > { %vm2581_vm12 = vmpackc.low %vm389_vm10, %vm388_vm11 }
  0xa4   : > { %527 = vperm.xlu1 %2824, %v3165_v7   ;;  %2578 = vmatmul.mubr.msk.bf16.gmra.mxu0 %vm2577_vm6, %v3044_v53 }
  0xa5   : > { %1671 = vmatprep.mubr.bf16.mxu0 %v4614_v0  ;;  %v363_v63 = vpop.permute.xlu1 %362  ;;  %v360_v1 = vpop.permute.xlu0 %359 }
  0xa6   : > { %vm391_vm13 = vcmp.eq.s32.totalorder %v3290_v49, %v363_v63  ;;  %vm390_vm14 = vcmp.eq.s32.totalorder %v3290_v49, %v360_v1 }
  0xa7   : > { %vm2583_vm15 = vmpackc.low %vm391_vm13, %vm390_vm14 }
  0xa8   : > { %536 = vperm.xlu1 %2824, %v3170_v8  }
  0xa9   : > { %v369_v2 = vpop.permute.xlu1 %368  ;;  %v366_v3 = vpop.permute.xlu0 %365 }
  0xaa   : > { %vm393_vm1 = vcmp.eq.s32.totalorder %v3290_v49, %v369_v2  ;;  %vm392_vm2 = vcmp.eq.s32.totalorder %v3290_v49, %v366_v3 }
  0xab   : > { %vm2585_vm3 = vmpackc.low %vm393_vm1, %vm392_vm2 }
  0xac   : > { %2825 = vset.pattern.permute.xlu1 %v4626_v33  ;;  %2580 = vmatmul.mubr.msk.bf16.gmra.mxu0 %vm2579_vm9, %v3044_v53 }
  0xad   : > { %629 = vperm.xlu1 %2825, %v3162_v6   ;;  %1679 = vmatprep.mubr.bf16.mxu0 %v4614_v0  ;;  %v375_v4 = vpop.permute.xlu1 %374  ;;  %v372_v5 = vpop.permute.xlu0 %371 }
  0xae   : > { %vm395_vm4 = vcmp.eq.s32.totalorder %v3290_v49, %v375_v4  ;;  %vm394_vm5 = vcmp.eq.s32.totalorder %v3290_v49, %v372_v5 }
  0xaf   : > { %vm2587_vm6 = vmpackc.low %vm395_vm4, %vm394_vm5 }
  0xb1   : > { %2826 = vset.pattern.permute.xlu1 %v4630_v51  ;;  %v381_v10 = vpop.permute.xlu1 %380  ;;  %v378_v11 = vpop.permute.xlu0 %377 }
  0xb2   : > { %1071 = vperm.xlu1 %2826, %v3165_v7   ;;  %vm397_vm7 = vcmp.eq.s32.totalorder %v3290_v49, %v381_v10  ;;  %vm396_vm8 = vcmp.eq.s32.totalorder %v3290_v49, %v378_v11  ;;  %v4620_v10 = vmov 9  }
  0xb3   : > { %1429 = vadd.xlane.f32.xlu0 %v1428_v60  ;;  %vm2589_vm9 = vmpackc.low %vm397_vm7, %vm396_vm8 }
  0xb4   : > { %2582 = vmatmul.mubr.msk.bf16.gmra.mxu0 %vm2581_vm12, %v3044_v53 }
  0xb5   : > { %1687 = vmatprep.mubr.bf16.mxu0 %v4614_v0 }
  0xb6   : > { %1074 = vperm.xlu1 %2826, %v3173_v9  }
  0xb7   : > { %1435 = vadd.xlane.f32.xlu0 %v1434_v62 }
  0xba   : > { %2828 = vset.pattern.permute.xlu1 %v3040_v34  ;;  %v330_v34 = vld [vmem:[%s3265_s23 + $0x70] sm:$0xff] }
  0xbb   : > { %v1449_v36 = vsel %vm1406_vm0, %v330_v34, 0.0 }
  0xbc   : > { %2584 = vmatmul.mubr.msk.bf16.gmra.mxu0 %vm2583_vm15, %v3044_v53 }
  0xbd   : > { %1695 = vmatprep.mubr.bf16.mxu0 %v4614_v0 }
  0xc4   : > { %2586 = vmatmul.mubr.msk.bf16.gmra.mxu0 %vm2585_vm3, %v3044_v53 }
  0xc5   : > { %1703 = vmatprep.mubr.bf16.mxu0 %v4614_v0 }
  0xcc   : > { %2588 = vmatmul.mubr.msk.bf16.gmra.mxu0 %vm2587_vm6, %v3044_v53 }
  0xcd   : > { %1077 = vperm.xlu0 %2838, %v3162_v6   ;;  %1711 = vmatprep.mubr.bf16.mxu0 %v4614_v0 }
  0xd1   : > { %1086 = vperm.xlu0 %2838, %v3184_v12  }
  0xd4   : > { %2590 = vmatmul.mubr.msk.bf16.gmra.mxu0 %vm2589_vm9, %v3044_v53 }
  0xd5   : > { %1092 = vperm.xlu0 %2838, %v3198_v16   ;;  %1719 = vmatprep.mubr.bf16.mxu0 %v4614_v0 }
  0xd9   : > { %2849 = vset.pattern.permute.xlu0 %v4626_v33 }
  0xda   : > { %1423 = vadd.xlane.f32.xlu1 %v1422_v15 }
  0xde   : > { %v3386_v42 = vpop.xlane.xlu0 %1411 }
  0xe2   : > { %v3394_v45 = vpop.xlane.xlu0 %1414 }
  0xe3   : > { %v3369_v27 = vpop.xlane.xlu1 %1408 }
  0xe6   : > { %v3402_v50 = vpop.xlane.xlu0 %1420 }
  0xe7   : > { %v3371_v30 = vpop.permute.xlu1 %623 }
  0xeb   : > { %434 = vperm.xlu1 %2828, %v3173_v9   ;;  %v3377_v38 = vpop.permute.xlu1 %626 }
  0xee   : > { %v432_v58 = vpop.permute.xlu0 %431 }
  0xef   : > { %437 = vperm.xlu1 %2828, %v3162_v6   ;;  %vm478_vm10 = vcmp.eq.s32.totalorder %v3290_v49, %v432_v58 }
  0xf2   : > { %v441_v2 = vpop.permute.xlu0 %440 }
  0xf3   : > { %443 = vperm.xlu1 %2828, %v3187_v13   ;;  %vm481_vm13 = vcmp.eq.s32.totalorder %v3290_v49, %v441_v2 }
  0xf4   : > { %1441 = vadd.xlane.f32.xlu0 %v1440_v19 }
  0xf6   : > { %v447_v15 = vpop.permute.xlu0 %446 }
  0xf7   : > { %449 = vperm.xlu1 %2828, %v3201_v17   ;;  %vm483_vm1 = vcmp.eq.s32.totalorder %v3290_v49, %v447_v15 }
  0xf8   : > { %1444 = vadd.xlane.f32.xlu0 %v1443_v23 }
  0xfb   : > { %455 = vperm.xlu1 %2828, %v3213_v21  }
  0xff   : > { %464 = vperm.xlu1 %2828, %v3224_v24  }
 0x103   : > { %470 = vperm.xlu1 %2828, %v3238_v28  }
 0x107   : > { %476 = vperm.xlu1 %2828, %v3251_v31  }
 0x10b   : > { %2830 = vset.pattern.permute.xlu1 %v4622_v43 }
 0x10c   : > { %539 = vperm.xlu1 %2830, %v3187_v13  }
 0x10e   : > { %632 = vperm.xlu0 %2849, %v3170_v8  }
 0x110   : > { %2831 = vset.pattern.permute.xlu1 %v4626_v33 }
 0x111   : > { %635 = vperm.xlu1 %2831, %v3187_v13  }
 0x112   : > { %641 = vperm.xlu0 %2849, %v3201_v17  }
 0x115   : > { %638 = vperm.xlu1 %2831, %v3184_v12  }
 0x116   : > { %647 = vperm.xlu0 %2849, %v3213_v21  }
 0x119   : > { %2832 = vset.pattern.permute.xlu1 %v4630_v51 }
 0x11a   : > { %1080 = vperm.xlu1 %2832, %v3170_v8   ;;  %656 = vperm.xlu0 %2849, %v3224_v24  }
 0x11c   : > { %v3379_v39 = vpop.xlane.xlu1 %1417 }
 0x11e   : > { %662 = vperm.xlu0 %2849, %v3238_v28   ;;  %2833 = vset.pattern.permute.xlu1 %v4618_v26 }
 0x120   : > { %v3381_v40 = vpop.permute.xlu1 %527 }
 0x122   : > { %2857 = vset.pattern.permute.xlu0 %v4618_v26 }
 0x124   : > { %v3383_v41 = vpop.permute.xlu1 %536 }
 0x128   : > { %v3388_v44 = vpop.permute.xlu1 %629 }
 0x12d   : > { %v3396_v47 = vpop.permute.xlu1 %1071 }
 0x131   : > { %v3404_v52 = vpop.permute.xlu1 %1074 }
 0x132   : > { %4651 = vst [vmem:[#allocation6_spill] sm:$0xff] %v3404_v52 }
 0x13d   : > { %1450 = vadd.xlane.f32.xlu0 %v1449_v36  ;;  %v453_v36 = vpop.permute.xlu0 %452 }
 0x13e   : > { %1426 = vadd.xlane.f32.xlu1 %v1425_v37  ;;  %vm485_vm4 = vcmp.eq.s32.totalorder %v3290_v49, %v453_v36 }
 0x14f   : > { %959 = vperm.xlu1 %2833, %v3165_v7  }
 0x153   : > { %962 = vperm.xlu1 %2833, %v3173_v9   ;;  %965 = vperm.xlu0 %2857, %v3162_v6  }
 0x157   : > { %968 = vperm.xlu1 %2833, %v3170_v8   ;;  %974 = vperm.xlu0 %2857, %v3184_v12  }
 0x15b   : > { %971 = vperm.xlu1 %2833, %v3187_v13   ;;  %980 = vperm.xlu0 %2857, %v3198_v16  }
 0x15c   : > { %v3400_v48 = vpop.f32.mrf.mxu0 }
 0x15d   : > { %4650 = vst [vmem:[#allocation5_spill] sm:$0xff] %v3400_v48 }
 0x15e   : > { %v1659_v54 = vpop.f32.mrf.mxu0 }
 0x15f   : > { %2834 = vset.pattern.permute.xlu1 %v4622_v43  ;;  %995 = vperm.xlu0 %2857, %v3241_v29  }
 0x160   : > { %545 = vperm.xlu1 %2834, %v3201_v17   ;;  %v3409_v55 = vpop.f32.mrf.mxu0 }
 0x161   : > { %4652 = vst [vmem:[#allocation7_spill] sm:$0xff] %v3409_v55  ;;  %v3669_v55 = vld [vmem:[%s3156_s17 + $0x28] sm:$0xff] }
 0x162   : > { %v1662_v56 = vpop.f32.mrf.mxu0 }
 0x163   : > { %v3411_v57 = vpop.xlane.xlu1 %1423  ;;  %2862 = vset.pattern.permute.xlu0 %v4622_v43 }
 0x164   : > { %4653 = vst [vmem:[#allocation8_spill] sm:$0xff] %v3411_v57  ;;  %548 = vperm.xlu1 %2834, %v3198_v16   ;;  %530 = vperm.xlu0 %2862, %v3173_v9   ;;  %v3416_v59 = vpop.f32.mrf.mxu0 }
 0x165   : > { %4654 = vst [vmem:[#allocation9_spill] sm:$0xff] %v3416_v59 }
 0x166   : > { %v1667_v60 = vpop.f32.mrf.mxu0 }
 0x167   : > { %v435_v61 = vpop.permute.xlu1 %434 }
 0x168   : > { %vm479_vm11 = vcmp.eq.s32.totalorder %v3290_v49, %v435_v61  ;;  %2835 = vset.pattern.permute.xlu1 %v4626_v33  ;;  %533 = vperm.xlu0 %2862, %v3162_v6   ;;  %v3422_v62 = vpop.f32.mrf.mxu0  ;;  %v459_v61 = vpop.permute.xlu0 %458 }
 0x169   : > { %vm2591_vm12 = vmpackc.low %vm479_vm11, %vm478_vm10  ;;  %4655 = vst [vmem:[#allocation10_spill] sm:$0xff] %v3422_v62  ;;  %644 = vperm.xlu1 %2835, %v3198_v16   ;;  %vm487_vm7 = vcmp.eq.s32.totalorder %v3290_v49, %v459_v61 }
 0x16a   : > { %2592 = vmatmul.mubr.msk.bf16.gmra.mxu0 %vm2591_vm12, %v3044_v53  ;;  %v1670_v63 = vpop.f32.mrf.mxu0 }
 0x16b   : > { %v438_v1 = vpop.permute.xlu1 %437  ;;  %1727 = vmatprep.mubr.bf16.mxu0 %v4614_v0 }
 0x16c   : > { %542 = vperm.xlu0 %2862, %v3184_v12   ;;  %v3428_v3 = vpop.f32.mrf.mxu0  ;;  %vm480_vm14 = vcmp.eq.s32.totalorder %v3290_v49, %v438_v1  ;;  %v462_v15 = vpop.permute.xlu0 %461 }
 0x16d   : > { %4656 = vst [vmem:[#allocation11_spill] sm:$0xff] %v3428_v3  ;;  %2836 = vset.pattern.permute.xlu1 %v4630_v51  ;;  %vm2593_vm15 = vmpackc.low %vm481_vm13, %vm480_vm14  ;;  %vm488_vm10 = vcmp.eq.s32.totalorder %v3290_v49, %v462_v15 }
 0x16e   : > { %1083 = vperm.xlu1 %2836, %v3187_v13   ;;  %v1675_v4 = vpop.f32.mrf.mxu0 }
 0x16f   : > { %v444_v11 = vpop.permute.xlu1 %443 }
 0x170   : > { %557 = vperm.xlu0 %2862, %v3227_v25   ;;  %v3435_v5 = vpop.f32.mrf.mxu0  ;;  %vm482_vm2 = vcmp.eq.s32.totalorder %v3290_v49, %v444_v11 }
 0x171   : > { %4657 = vst [vmem:[#allocation12_spill] sm:$0xff] %v3435_v5  ;;  %vm2595_vm3 = vmpackc.low %vm483_vm1, %vm482_vm2  ;;  %v3650_v5 = vld [vmem:[%s3156_s17 + $0x10] sm:$0xff] }
 0x172   : > { %2594 = vmatmul.mubr.msk.bf16.gmra.mxu0 %vm2593_vm15, %v3044_v53  ;;  %2837 = vset.pattern.permute.xlu1 %v4620_v10  ;;  %v1678_v14 = vpop.f32.mrf.mxu0 }
 0x173   : > { %1735 = vmatprep.mubr.bf16.mxu0 %v4614_v0  ;;  %v450_v23 = vpop.permute.xlu1 %449  ;;  %v324_v14 = vld [vmem:[%s3265_s23 + $0x40] sm:$0xff] }
 0x174   : > { %563 = vperm.xlu0 %2862, %v3241_v29   ;;  %v3441_v18 = vpop.f32.mrf.mxu0  ;;  %vm484_vm5 = vcmp.eq.s32.totalorder %v3290_v49, %v450_v23 }
 0x175   : > { %4658 = vst [vmem:[#allocation13_spill] sm:$0xff] %v3441_v18  ;;  %vm2597_vm6 = vmpackc.low %vm485_vm4, %vm484_vm5 }
 0x176   : > { %v1683_v19 = vpop.f32.mrf.mxu0 }
 0x177   : > { %v456_v58 = vpop.permute.xlu1 %455 }
 0x178   : > { %572 = vperm.xlu0 %2862, %v3251_v31   ;;  %v3446_v22 = vpop.f32.mrf.mxu0  ;;  %vm486_vm8 = vcmp.eq.s32.totalorder %v3290_v49, %v456_v58 }
 0x179   : > { %4659 = vst [vmem:[#allocation14_spill] sm:$0xff] %v3446_v22  ;;  %vm2599_vm9 = vmpackc.low %vm487_vm7, %vm486_vm8 }
 0x17a   : > { %2596 = vmatmul.mubr.msk.bf16.gmra.mxu0 %vm2595_vm3, %v3044_v53  ;;  %v1686_v34 = vpop.f32.mrf.mxu0 }
 0x17b   : > { %1743 = vmatprep.mubr.bf16.mxu0 %v4614_v0  ;;  %v465_v4 = vpop.permute.xlu1 %464  ;;  %v1431_v34 = vsel %vm1406_vm0, %v324_v14, 0.0 }
 0x17c   : > { %2865 = vset.pattern.permute.xlu0 %v4616_v35  ;;  %v3451_v37 = vpop.f32.mrf.mxu0  ;;  %vm489_vm11 = vcmp.eq.s32.totalorder %v3290_v49, %v465_v4 }
 0x17d   : > { %4660 = vst [vmem:[#allocation15_spill] sm:$0xff] %v3451_v37  ;;  %747 = vperm.xlu0 %2865, %v3187_v13   ;;  %vm2601_vm12 = vmpackc.low %vm489_vm11, %vm488_vm10 }
 0x17e   : > { %v1691_v54 = vpop.f32.mrf.mxu0 }
 0x17f   : > { %v471_v54 = vpop.permute.xlu1 %470 }
 0x180   : > { %v3456_v56 = vpop.f32.mrf.mxu0  ;;  %vm491_vm14 = vcmp.eq.s32.totalorder %v3290_v49, %v471_v54 }
 0x181   : > { %4661 = vst [vmem:[#allocation16_spill] sm:$0xff] %v3456_v56  ;;  %756 = vperm.xlu0 %2865, %v3198_v16  }
 0x182   : > { %2598 = vmatmul.mubr.msk.bf16.gmra.mxu0 %vm2597_vm6, %v3044_v53  ;;  %v1694_v60 = vpop.f32.mrf.mxu0 }
 0x183   : > { %1751 = vmatprep.mubr.bf16.mxu0 %v4614_v0  ;;  %v468_v60 = vpop.permute.xlu0 %467 }
 0x184   : > { %v3461_v63 = vpop.f32.mrf.mxu0  ;;  %vm490_vm13 = vcmp.eq.s32.totalorder %v3290_v49, %v468_v60 }
 0x185   : > { %4662 = vst [vmem:[#allocation17_spill] sm:$0xff] %v3461_v63  ;;  %762 = vperm.xlu0 %2865, %v3210_v20   ;;  %vm2603_vm15 = vmpackc.low %vm491_vm14, %vm490_vm13 }
 0x186   : > { %v1699_v1 = vpop.f32.mrf.mxu0 }
 0x187   : > { %v474_v15 = vpop.permute.xlu0 %473 }
 0x188   : > { %v3466_v2 = vpop.f32.mrf.mxu0  ;;  %vm492_vm1 = vcmp.eq.s32.totalorder %v3290_v49, %v474_v15 }
 0x189   : > { %4663 = vst [vmem:[#allocation18_spill] sm:$0xff] %v3466_v2  ;;  %765 = vperm.xlu0 %2865, %v3227_v25  }
 0x18a   : > { %2600 = vmatmul.mubr.msk.bf16.gmra.mxu0 %vm2599_vm9, %v3044_v53  ;;  %v1702_v11 = vpop.f32.mrf.mxu0 }
 0x18b   : > { %1759 = vmatprep.mubr.bf16.mxu0 %v4614_v0  ;;  %v477_v11 = vpop.permute.xlu1 %476  ;;  %v3618_v22 = vpop.permute.xlu0 %856 }
 0x18c   : > { %v3472_v19 = vpop.f32.mrf.mxu0  ;;  %vm493_vm2 = vcmp.eq.s32.totalorder %v3290_v49, %v477_v11 }
 0x18d   : > { %4664 = vst [vmem:[#allocation19_spill] sm:$0xff] %v3472_v19  ;;  %771 = vperm.xlu0 %2865, %v3241_v29   ;;  %vm2605_vm3 = vmpackc.low %vm493_vm2, %vm492_vm1 }
 0x18e   : > { %v1707_v23 = vpop.f32.mrf.mxu0 }
 0x18f   : > { %v4628_v23 = vmov 8  }
 0x190   : > { %v3478_v36 = vpop.f32.mrf.mxu0 }
 0x191   : > { %4665 = vst [vmem:[#allocation20_spill] sm:$0xff] %v3478_v36  ;;  %780 = vperm.xlu0 %2865, %v3251_v31  }
 0x192   : > { %1432 = vadd.xlane.f32.xlu1 %v1431_v34  ;;  %2602 = vmatmul.mubr.msk.bf16.gmra.mxu0 %vm2601_vm12, %v3044_v53  ;;  %v1710_v58 = vpop.f32.mrf.mxu0 }
 0x193   : > { %1767 = vmatprep.mubr.bf16.mxu0 %v4614_v0 }
 0x194   : > { %v3483_v61 = vpop.f32.mrf.mxu0 }
 0x195   : > { %4666 = vst [vmem:[#allocation21_spill] sm:$0xff] %v3483_v61  ;;  %2870 = vset.pattern.permute.xlu0 %v4624_v46 }
 0x196   : > { %889 = vperm.xlu0 %2870, %v3254_v32   ;;  %v1715_v1 = vpop.f32.mrf.mxu0 }
 0x198   : > { %v3489_v4 = vpop.f32.mrf.mxu0 }
 0x199   : > { %4667 = vst [vmem:[#allocation22_spill] sm:$0xff] %v3489_v4  ;;  %v4686_v4 = vmov 8  }
 0x19a   : > { %2604 = vmatmul.mubr.msk.bf16.gmra.mxu0 %vm2603_vm15, %v3044_v53  ;;  %2871 = vset.pattern.permute.xlu0 %v4620_v10  ;;  %v1718_v14 = vpop.f32.mrf.mxu0 }
 0x19b   : > { %1775 = vmatprep.mubr.bf16.mxu0 %v4614_v0  ;;  %1322 = vperm.xlu0 %2871, %v3210_v20  }
 0x19f   : > { %1334 = vperm.xlu0 %2871, %v3238_v28  }
 0x1a2   : > { %2606 = vmatmul.mubr.msk.bf16.gmra.mxu0 %vm2605_vm3, %v3044_v53  ;;  %v3521_v53 = vpop.permute.xlu1 %539 }
 0x1a3   : > { %1295 = vperm.xlu1 %2837, %v3165_v7   ;;  %2874 = vset.pattern.permute.xlu0 %v4630_v51  ;;  %vm578_vm5 = vcmp.eq.s32.totalorder %v3290_v49, %v3521_v53 }
 0x1a4   : > { %1107 = vperm.xlu0 %2874, %v3241_v29   ;;  %1783 = vmatprep.mubr.bf16.mxu0 %v4614_v0 }
 0x1a6   : > { %v3525_v34 = vpop.permute.xlu1 %635 }
 0x1a7   : > { %1298 = vperm.xlu1 %2837, %v3173_v9   ;;  %vm674_vm4 = vcmp.eq.s32.totalorder %v3290_v49, %v3525_v34  ;;  %v1459_v34 = vmax.f32 %v3402_v50, 1.0 }
 0x1a8   : > { %1113 = vperm.xlu0 %2874, %v3254_v32  }
 0x1a9   : > { %2929 = vrcp.f32 %v1459_v34 }
 0x1aa   : > { %v3529_v54 = vpop.permute.xlu1 %638 }
 0x1ab   : > { %1301 = vperm.xlu1 %2837, %v3162_v6   ;;  %4668 = vst [vmem:[#allocation23_spill] sm:$0xff] %v3529_v54  ;;  %v331_v54 = vld [vmem:[%s3265_s23 + $0x78] sm:$0xff] }
 0x1ac   : > { %2878 = vset.pattern.permute.xlu0 %v4628_v23 }
 0x1ad   : > { %1228 = vperm.xlu0 %2878, %v3251_v31  }
 0x1ae   : > { %v3533_v58 = vpop.permute.xlu1 %1080 }
 0x1af   : > { %1304 = vperm.xlu1 %2837, %v3170_v8   ;;  %v326_v8 = vld [vmem:[%s3265_s23 + $0x50] sm:$0xff]  ;;  %4669 = vst [vmem:[#allocation24_spill] sm:$0xff] %v3533_v58 }
 0x1b0   : > { %v1437_v32 = vsel %vm1406_vm0, %v326_v8, 0.0 }
 0x1b1   : > { %2880 = vset.pattern.permute.xlu0 %v4620_v10 }
 0x1b3   : > { %1307 = vperm.xlu1 %2837, %v3187_v13  }
 0x1b7   : > { %1310 = vperm.xlu1 %2837, %v3184_v12  }
 0x1bb   : > { %2839 = vset.pattern.permute.xlu1 %v4618_v26 }
 0x1bc   : > { %977 = vperm.xlu1 %2839, %v3201_v17  }
 0x1c0   : > { %2840 = vset.pattern.permute.xlu1 %v4622_v43 }
 0x1c1   : > { %551 = vperm.xlu1 %2840, %v3213_v21  }
 0x1c5   : > { %554 = vperm.xlu1 %2840, %v3210_v20  }
 0x1c7   : > { %v3536_v60 = vpop.xlane.xlu1 %1426 }
 0x1c8   : > { %4670 = vst [vmem:[#allocation25_spill] sm:$0xff] %v3536_v60 }
 0x1c9   : > { %2841 = vset.pattern.permute.xlu1 %v4626_v33 }
 0x1ca   : > { %650 = vperm.xlu1 %2841, %v3210_v20  }
 0x1cb   : > { %v3539_v31 = vpop.permute.xlu1 %959 }
 0x1cc   : > { %4671 = vst [vmem:[#allocation26_spill] sm:$0xff] %v3539_v31 }
 0x1ce   : > { %2842 = vset.pattern.permute.xlu1 %v4630_v51 }
 0x1cf   : > { %1089 = vperm.xlu1 %2842, %v3201_v17  }
 0x1d3   : > { %2843 = vset.pattern.permute.xlu1 %v4624_v46 }
 0x1f3   : > { %1438 = vadd.xlane.f32.xlu1 %v1437_v32 }
 0x204   : > { %847 = vperm.xlu1 %2843, %v3165_v7   ;;  %v3543_v7 = vpop.permute.xlu1 %962 }
 0x205   : > { %4672 = vst [vmem:[#allocation27_spill] sm:$0xff] %v3543_v7 }
 0x208   : > { %850 = vperm.xlu1 %2843, %v3173_v9   ;;  %v3546_v9 = vpop.permute.xlu1 %968 }
 0x209   : > { %4673 = vst [vmem:[#allocation28_spill] sm:$0xff] %v3546_v9  ;;  %v4724_v9 = vmov 7  }
 0x20c   : > { %853 = vperm.xlu1 %2843, %v3162_v6   ;;  %v3551_v6 = vpop.permute.xlu1 %971 }
 0x20d   : > { %vm1010_vm7 = vcmp.eq.s32.totalorder %v3290_v49, %v3551_v6 }
 0x210   : > { %859 = vperm.xlu1 %2843, %v3187_v13   ;;  %v3558_v11 = vpop.permute.xlu1 %545 }
 0x211   : > { %4676 = vst [vmem:[#allocation31_spill] sm:$0xff] %v3558_v11  ;;  %v3732_v11 = vld [vmem:[%s3156_s17 + $0x50] sm:$0xff] }
 0x214   : > { %862 = vperm.xlu1 %2843, %v3184_v12  }
 0x218   : > { %865 = vperm.xlu1 %2843, %v3201_v17  }
 0x21c   : > { %868 = vperm.xlu1 %2843, %v3198_v16  }
 0x220   : > { %871 = vperm.xlu1 %2843, %v3213_v21  }
 0x224   : > { %874 = vperm.xlu1 %2843, %v3210_v20  }
 0x228   : > { %2844 = vset.pattern.permute.xlu1 %v4620_v10 }
 0x229   : > { %1313 = vperm.xlu1 %2844, %v3201_v17   ;;  %v3564_v17 = vpop.permute.xlu1 %548 }
 0x22a   : > { %v3553_v12 = vpop.f32.mrf.mxu0  ;;  %vm581_vm9 = vcmp.eq.s32.totalorder %v3290_v49, %v3564_v17 }
 0x22b   : > { %4674 = vst [vmem:[#allocation29_spill] sm:$0xff] %v3553_v12  ;;  %v3673_v12 = vld [vmem:[%s3156_s17 + $0x30] sm:$0xff] }
 0x22c   : > { %v1723_v13 = vpop.f32.mrf.mxu0 }
 0x22d   : > { %1316 = vperm.xlu1 %2844, %v3198_v16  }
 0x22e   : > { %v3556_v1 = vpop.f32.mrf.mxu0 }
 0x22f   : > { %4675 = vst [vmem:[#allocation30_spill] sm:$0xff] %v3556_v1 }
 0x230   : > { %v1726_v14 = vpop.f32.mrf.mxu0 }
 0x231   : > { %2845 = vset.pattern.permute.xlu1 %v4618_v26  ;;  %v3573_v14 = vpop.permute.xlu1 %644 }
 0x232   : > { %983 = vperm.xlu1 %2845, %v3213_v21   ;;  %v3562_v15 = vpop.f32.mrf.mxu0  ;;  %vm677_vm8 = vcmp.eq.s32.totalorder %v3290_v49, %v3573_v14 }
 0x233   : > { %4677 = vst [vmem:[#allocation32_spill] sm:$0xff] %v3562_v15  ;;  %v2965_v15 = vld [vmem:[%s3156_s17 + $0x20] sm:$0xff] }
 0x234   : > { %v1731_v8 = vpop.f32.mrf.mxu0 }
 0x235   : > { %v3579_v26 = vpop.permute.xlu1 %1083 }
 0x236   : > { %986 = vperm.xlu1 %2845, %v3210_v20   ;;  %v3567_v32 = vpop.f32.mrf.mxu0  ;;  %vm1122_vm10 = vcmp.eq.s32.totalorder %v3290_v49, %v3579_v26 }
 0x237   : > { %4678 = vst [vmem:[#allocation33_spill] sm:$0xff] %v3567_v32 }
 0x238   : > { %v1734_v13 = vpop.f32.mrf.mxu0 }
 0x23a   : > { %2846 = vset.pattern.permute.xlu1 %v4622_v43  ;;  %v3570_v16 = vpop.f32.mrf.mxu0  ;;  %v3585_v43 = vpop.xlane.xlu1 %1432 }
 0x23b   : > { %4679 = vst [vmem:[#allocation34_spill] sm:$0xff] %v3570_v16  ;;  %560 = vperm.xlu1 %2846, %v3224_v24   ;;  %4682 = vst [vmem:[#allocation37_spill] sm:$0xff] %v3585_v43  ;;  %v3656_v16 = vld [vmem:[%s3156_s17 + $0x18] sm:$0xff] }
 0x23c   : > { %v1739_v0 = vpop.f32.mrf.mxu0 }
 0x23e   : > { %v3575_v35 = vpop.f32.mrf.mxu0  ;;  %v3592_v23 = vpop.permute.xlu1 %1295 }
 0x23f   : > { %4680 = vst [vmem:[#allocation35_spill] sm:$0xff] %v3575_v35  ;;  %2847 = vset.pattern.permute.xlu1 %v4626_v33  ;;  %4685 = vst [vmem:[#allocation40_spill] sm:$0xff] %v3592_v23 }
 0x240   : > { %653 = vperm.xlu1 %2847, %v3227_v25   ;;  %v1742_v8 = vpop.f32.mrf.mxu0 }
 0x242   : > { %v3581_v10 = vpop.f32.mrf.mxu0 }
 0x243   : > { %4681 = vst [vmem:[#allocation36_spill] sm:$0xff] %v3581_v10  ;;  %v3644_v10 = vld [vmem:[%s3156_s17 + $0x8] sm:$0xff] }
 0x244   : > { %2848 = vset.pattern.permute.xlu1 %v4630_v51  ;;  %v1747_v13 = vpop.f32.mrf.mxu0 }
 0x245   : > { %1095 = vperm.xlu1 %2848, %v3213_v21   ;;  %v3597_v13 = vpop.permute.xlu1 %1298 }
 0x246   : > { %v3587_v46 = vpop.f32.mrf.mxu0  ;;  %4688 = vst [vmem:[#allocation42_spill] sm:$0xff] %v3597_v13 }
 0x247   : > { %4683 = vst [vmem:[#allocation38_spill] sm:$0xff] %v3587_v46 }
 0x248   : > { %v1750_v0 = vpop.f32.mrf.mxu0 }
 0x249   : > { %1098 = vperm.xlu1 %2848, %v3210_v20   ;;  %v3603_v0 = vpop.permute.xlu1 %1301 }
 0x24a   : > { %v3590_v33 = vpop.f32.mrf.mxu0  ;;  %4691 = vst [vmem:[#allocation45_spill] sm:$0xff] %v3603_v0  ;;  %v3704_v0 = vld [vmem:[%s3156_s17 + $0x40] sm:$0xff] }
 0x24b   : > { %4684 = vst [vmem:[#allocation39_spill] sm:$0xff] %v3590_v33 }
 0x24c   : > { %v1755_v8 = vpop.f32.mrf.mxu0 }
 0x24d   : > { %2850 = vset.pattern.permute.xlu1 %v4686_v4  ;;  %v3607_v8 = vpop.permute.xlu1 %1304 }
 0x24e   : > { %v3595_v61 = vpop.f32.mrf.mxu0  ;;  %4693 = vst [vmem:[#allocation47_spill] sm:$0xff] %v3607_v8 }
 0x24f   : > { %4687 = vst [vmem:[#allocation41_spill] sm:$0xff] %v3595_v61 }
 0x250   : > { %v1758_v51 = vpop.f32.mrf.mxu0 }
 0x251   : > { %v3613_v18 = vpop.permute.xlu1 %1307 }
 0x252   : > { %v3599_v36 = vpop.f32.mrf.mxu0  ;;  %vm1346_vm13 = vcmp.eq.s32.totalorder %v3290_v49, %v3613_v18 }
 0x253   : > { %4689 = vst [vmem:[#allocation43_spill] sm:$0xff] %v3599_v36 }
 0x254   : > { %v1763_v19 = vpop.f32.mrf.mxu0 }
 0x256   : > { %v3601_v2 = vpop.f32.mrf.mxu0 }
 0x257   : > { %4690 = vst [vmem:[#allocation44_spill] sm:$0xff] %v3601_v2  ;;  %v329_v2 = vld [vmem:[%s3265_s23 + $0x68] sm:$0xff]  ;;  %s3050_s23 = smov [#allocation2]  }
 0x258   : > { %v1766_v63 = vpop.f32.mrf.mxu0  ;;  %s2980_s30 = sshll.u32 %s3050_s23, 4  ;;  %s2981_s30 = int_to_ptr.vmem [resolvable:$false] %s2980_s30 }
 0x259   : > { %s2982_s12 = scalar_lea.vmem %s2981_s30, 4096  ;;  %p2983_p0 = scmp.lt.s32.totalorder %s4562_s11, %s2981_s30 }
 0x25a   : > { %v3605_v37 = vpop.f32.mrf.mxu0  ;;  %p2984_p1 = scmp.lt.s32.totalorder %s2982_s12, %s2976_s16 }
 0x25b   : > { %4692 = vst [vmem:[#allocation46_spill] sm:$0xff] %v3605_v37  ;;  %v3620_v37 = vpop.permute.xlu1 %1310 }
 0x25c   : > { %v1771_v56 = vpop.f32.mrf.mxu0  ;;  %4697 = vst [vmem:[#allocation51_spill] sm:$0xff] %v3620_v37  ;;  %p2985_p2 = por %p2984_p1, %p2983_p0 }
 0x25d   : > { %v1446_v56 = vsel %vm1406_vm0, %v329_v2, 0.0 }
 0x25e   : > { %v3609_v33 = vpop.f32.mrf.mxu0  ;;  %p2986_p3 = pnand %p2985_p2, %p2979_p13 }
 0x25f   : > { %4694 = vst [vmem:[#allocation48_spill] sm:$0xff] %v3609_v33 }
 0x260   : > { %v1774_v61 = vpop.f32.mrf.mxu0 }
 0x261   : > { %v3623_v61 = vpop.xlane.xlu0 %1429 }
 0x262   : > { %v3611_v51 = vpop.f32.mrf.mxu0  ;;  %v1462_v14 = vmax.f32 %v3623_v61, 1.0 }
 0x263   : > { %4695 = vst [vmem:[#allocation49_spill] sm:$0xff] %v3611_v51  ;;  %v3625_v51 = vpop.permute.xlu1 %977 }
 0x264   : > { %v1779_v36 = vpop.f32.mrf.mxu0  ;;  %4698 = vst [vmem:[#allocation52_spill] sm:$0xff] %v3625_v51  ;;  %v4712_v51 = vmov 5   ;;  %2931 = vrcp.f32 %v1462_v14 }
 0x265   : > { %v3627_v33 = vpop.xlane.xlu0 %1435 }
 0x266   : > { %v3615_v19 = vpop.f32.mrf.mxu0 }
 0x267   : > { %4696 = vst [vmem:[#allocation50_spill] sm:$0xff] %v3615_v19  ;;  %v3629_v36 = vpop.permute.xlu1 %551 }
 0x268   : > { %v1782_v63 = vpop.f32.mrf.mxu0  ;;  %4699 = vst [vmem:[#allocation53_spill] sm:$0xff] %v3629_v36 }
 0x269   : > { %v3631_v19 = vpop.permute.xlu0 %1077  ;;  %v3636_v63 = vld [vmem:[%s3156_s17] sm:$0xff] }
 0x26a   : > { %4700 = vst [vmem:[#allocation54_spill] sm:$0xff] %v3631_v19 }
 0x26b   : > { %v3633_v46 = vpop.permute.xlu1 %554 }
 0x26c   : > { %vm583_vm3 = vcmp.eq.s32.totalorder %v3290_v49, %v3633_v46 }
 0x26d   : > { %1447 = vadd.xlane.f32.xlu1 %v1446_v56  ;;  %v3639_v2 = vpop.permute.xlu0 %1086 }
 0x26e   : > { %4701 = vst [vmem:[#allocation55_spill] sm:$0xff] %v3639_v2 }
 0x26f   : > { %v3641_v56 = vpop.permute.xlu1 %650 }
 0x270   : > { %vm679_vm1 = vcmp.eq.s32.totalorder %v3290_v49, %v3641_v56 }
 0x271   : > { %v3647_v3 = vpop.permute.xlu0 %1092 }
 0x272   : > { %vm1125_vm2 = vcmp.eq.s32.totalorder %v3290_v49, %v3647_v3 }
 0x273   : > { %v3653_v35 = vpop.permute.xlu1 %1089 }
 0x274   : > { %4702 = vst [vmem:[#allocation56_spill] sm:$0xff] %v3653_v35 }
 0x275   : > { %v3659_v32 = vpop.xlane.xlu0 %1441 }
 0x276   : > { %4703 = vst [vmem:[#allocation57_spill] sm:$0xff] %v3659_v32  ;;  %v2968_v32 = vld [vmem:[%s3156_s17 + $0x38] sm:$0xff] }
 0x279   : > { %v3664_v59 = vpop.xlane.xlu0 %1444 }
 0x27a   : > { %4705 = vst [vmem:[#allocation59_spill] sm:$0xff] %v3664_v59 }
 0x27c   : > { %v3661_v62 = vpop.xlane.xlu1 %1438 }
 0x27d   : > { %4704 = vst [vmem:[#allocation58_spill] sm:$0xff] %v3661_v62  ;;  %v3676_v48 = vpop.permute.xlu0 %632 }
 0x27e   : > { %1183 = vperm.xlu1 %2850, %v3636_v63   ;;  %4707 = vst [vmem:[#allocation61_spill] sm:$0xff] %v3676_v48 }
 0x280   : > { %v3666_v1 = vpop.permute.xlu1 %847 }
 0x281   : > { %4706 = vst [vmem:[#allocation60_spill] sm:$0xff] %v3666_v1  ;;  %v4723_v1 = vmov 3  }
 0x282   : > { %1186 = vperm.xlu1 %2850, %v3644_v10  }
 0x284   : > { %v3678_v35 = vpop.permute.xlu1 %850 }
 0x285   : > { %4708 = vst [vmem:[#allocation62_spill] sm:$0xff] %v3678_v35  ;;  %v4718_v35 = vmov 6  }
 0x286   : > { %1189 = vperm.xlu1 %2850, %v3650_v5  }
 0x288   : > { %v3683_v59 = vpop.permute.xlu1 %853 }
 0x289   : > { %4710 = vst [vmem:[#allocation64_spill] sm:$0xff] %v3683_v59  ;;  %v4715_v59 = vmov 9  }
 0x28a   : > { %1192 = vperm.xlu1 %2850, %v3656_v16  }
 0x28c   : > { %v3689_v36 = vpop.permute.xlu1 %859 }
 0x28e   : > { %1195 = vperm.xlu1 %2850, %v2965_v15   ;;  %v3681_v15 = vpop.permute.xlu0 %641 }
 0x28f   : > { %4709 = vst [vmem:[#allocation63_spill] sm:$0xff] %v3681_v15 }
 0x290   : > { %v3695_v8 = vpop.permute.xlu1 %862 }
 0x291   : > { %4714 = vst [vmem:[#allocation67_spill] sm:$0xff] %v3695_v8 }
 0x292   : > { %1198 = vperm.xlu1 %2850, %v3669_v55   ;;  %v3686_v62 = vpop.permute.xlu0 %647 }
 0x293   : > { %4711 = vst [vmem:[#allocation65_spill] sm:$0xff] %v3686_v62 }
 0x296   : > { %1201 = vperm.xlu1 %2850, %v3673_v12   ;;  %v3693_v37 = vpop.permute.xlu0 %656 }
 0x297   : > { %4713 = vst [vmem:[#allocation66_spill] sm:$0xff] %v3693_v37 }
 0x29a   : > { %1204 = vperm.xlu1 %2850, %v2968_v32   ;;  %v3698_v32 = vpop.permute.xlu0 %662 }
 0x29e   : > { %1207 = vperm.xlu1 %2850, %v3213_v21   ;;  %v3701_v21 = vpop.permute.xlu1 %865 }
 0x29f   : > { %4716 = vst [vmem:[#allocation68_spill] sm:$0xff] %v3701_v21  ;;  %v4721_v21 = vmov 2  }
 0x2a2   : > { %1210 = vperm.xlu1 %2850, %v3210_v20   ;;  %v3707_v20 = vpop.xlane.xlu0 %1450  ;;  %v3711_v8 = vpop.permute.xlu1 %868 }
 0x2a3   : > { %4717 = vst [vmem:[#allocation69_spill] sm:$0xff] %v3707_v20  ;;  %vm901_vm12 = vcmp.eq.s32.totalorder %v3290_v49, %v3711_v8 }
 0x2a6   : > { %2851 = vset.pattern.permute.xlu1 %v4712_v51  ;;  %v3714_v13 = vpop.permute.xlu0 %965  ;;  %v3716_v23 = vpop.permute.xlu1 %871 }
 0x2a7   : > { %877 = vperm.xlu1 %2851, %v3227_v25   ;;  %4719 = vst [vmem:[#allocation70_spill] sm:$0xff] %v3714_v13  ;;  %4720 = vst [vmem:[#allocation71_spill] sm:$0xff] %v3716_v23  ;;  %v3738_v23 = vld [vmem:[%s3156_s17 + $0x58] sm:$0xff] }
 0x2aa   : > { %v3720_v43 = vpop.permute.xlu0 %974  ;;  %v3722_v20 = vpop.permute.xlu1 %874 }
 0x2ab   : > { %880 = vperm.xlu1 %2851, %v3224_v24   ;;  %4722 = vst [vmem:[#allocation72_spill] sm:$0xff] %v3720_v43 }
 0x2af   : > { %2852 = vset.pattern.permute.xlu1 %v4715_v59 }
 0x2b0   : > { %1319 = vperm.xlu1 %2852, %v3704_v0  }
 0x2b4   : > { %2853 = vset.pattern.permute.xlu1 %v4718_v35 }
 0x2b5   : > { %989 = vperm.xlu1 %2853, %v3227_v25   ;;  %v3726_v25 = vpop.permute.xlu0 %980 }
 0x2b6   : > { %vm1013_vm15 = vcmp.eq.s32.totalorder %v3290_v49, %v3726_v25  ;;  %v1464_v25 = vmax.f32 %v3627_v33, 1.0 }
 0x2b8   : > { %2933 = vrcp.f32 %v1464_v25 }
 0x2b9   : > { %992 = vperm.xlu1 %2853, %v3224_v24   ;;  %v3729_v24 = vpop.permute.xlu1 %1313 }
 0x2ba   : > { %4725 = vst [vmem:[#allocation73_spill] sm:$0xff] %v3729_v24 }
 0x2bd   : > { %2854 = vset.pattern.permute.xlu1 %v4721_v21  ;;  %v3741_v43 = vpop.permute.xlu1 %1316 }
 0x2be   : > { %566 = vperm.xlu1 %2854, %v3238_v28   ;;  %v3735_v28 = vpop.permute.xlu0 %995 }
 0x2bf   : > { %4726 = vst [vmem:[#allocation74_spill] sm:$0xff] %v3735_v28 }
 0x2c1   : > { %v3746_v7 = vpop.permute.xlu1 %983 }
 0x2c2   : > { %2855 = vset.pattern.permute.xlu1 %v4723_v1  ;;  %v3744_v13 = vpop.permute.xlu0 %530  ;;  %4729 = vst [vmem:[#allocation76_spill] sm:$0xff] %v3746_v7 }
 0x2c3   : > { %659 = vperm.xlu1 %2855, %v3241_v29   ;;  %v4727_v29 = vmov 4   ;;  %4728 = vst [vmem:[#allocation75_spill] sm:$0xff] %v3744_v13  ;;  %v1452_v13 = vsel %vm1406_vm0, %v331_v54, 0.0  ;;  %vm898_vm0 = vcmp.eq.s32.totalorder %v3290_v49, %v3689_v36 }
 0x2c5   : > { %v3750_v31 = vpop.permute.xlu1 %986 }
 0x2c6   : > { %v3748_v24 = vpop.permute.xlu0 %533 }
 0x2c7   : > { %2856 = vset.pattern.permute.xlu1 %v4724_v9  ;;  %4730 = vst [vmem:[#allocation77_spill] sm:$0xff] %v3748_v24 }
 0x2c8   : > { %1101 = vperm.xlu1 %2856, %v3732_v11  }
 0x2c9   : > { %v3754_v37 = vpop.permute.xlu1 %560 }
 0x2ca   : > { %v3752_v60 = vpop.permute.xlu0 %542  ;;  %4732 = vst [vmem:[#allocation79_spill] sm:$0xff] %v3754_v37 }
 0x2cb   : > { %4731 = vst [vmem:[#allocation78_spill] sm:$0xff] %v3752_v60 }
 0x2cc   : > { %1104 = vperm.xlu1 %2856, %v3738_v23  }
 0x2cd   : > { %v3758_v58 = vpop.permute.xlu1 %653 }
 0x2ce   : > { %v3756_v28 = vpop.permute.xlu0 %557 }
 0x2d0   : > { %2858 = vset.pattern.permute.xlu1 %v4727_v29 }
 0x2d1   : > { %v3763_v15 = vpop.permute.xlu1 %1095 }
 0x2d2   : > { %v3760_v62 = vpop.permute.xlu0 %563  ;;  %4733 = vst [vmem:[#allocation80_spill] sm:$0xff] %v3763_v15  ;;  %v3049_v15 = vmov 0.0  }
 0x2d3   : > { %v2451_v54 = vsel %vm674_vm4, 1.0, %v3049_v15  ;;  %v2483_v53 = vsel %vm898_vm0, 1.0, %v3049_v15  ;;  %v2499_v50 = vsel %vm1010_vm7, 1.0, %v3049_v15  ;;  %v2515_v17 = vsel %vm1122_vm10, 1.0, %v3049_v15 }
 0x2d4   : > { %v2486_v61 = vsel %vm901_vm12, 1.0, %v3049_v15  ;;  %v2456_v14 = vsel %vm679_vm1, 1.0, %v3049_v15  ;;  %v2440_v33 = vsel %vm583_vm3, 1.0, %v3049_v15  ;;  %vm1015_vm0 = vcmp.eq.s32.totalorder %v3290_v49, %v3750_v31 }
 0x2d5   : > { %v3768_v24 = vpop.permute.xlu1 %1098  ;;  %v727_v3 = vadd.f32 %v2456_v14, %v2440_v33  ;;  %v3875_v14 = vld [vmem:[%s3156_s17 + $0x68] sm:$0xff]  ;;  %vm680_vm12 = vcmp.eq.s32.totalorder %v3290_v49, %v3758_v58  ;;  %vm683_vm1 = vcmp.eq.s32.totalorder %v3290_v49, %v3698_v32  ;;  %vm586_vm3 = vcmp.eq.s32.totalorder %v3290_v49, %v3760_v62 }
 0x2d6   : > { %v3766_v7 = vpop.permute.xlu0 %572 }
 0x2d7   : > { %4734 = vst [vmem:[#allocation81_spill] sm:$0xff] %v3766_v7 }
 0x2da   : > { %v748_v2 = vpop.permute.xlu0 %747 }
 0x2db   : > { %vm786_vm6 = vcmp.eq.s32.totalorder %v3290_v49, %v748_v2 }
 0x2de   : > { %v757_v7 = vpop.permute.xlu0 %756 }
 0x2df   : > { %vm789_vm11 = vcmp.eq.s32.totalorder %v3290_v49, %v757_v7 }
 0x2e0   : > { %v2470_v26 = vsel %vm789_vm11, 1.0, %v3049_v15  ;;  %vm584_vm11 = vcmp.eq.s32.totalorder %v3290_v49, %v3756_v28 }
 0x2e2   : > { %v763_v19 = vpop.permute.xlu0 %762 }
 0x2e3   : > { %vm791_vm4 = vcmp.eq.s32.totalorder %v3290_v49, %v763_v19 }
 0x2e4   : > { %v2472_v46 = vsel %vm791_vm4, 1.0, %v3049_v15 }
 0x2e6   : > { %v3793_v48 = vpop.permute.xlu0 %765 }
 0x2ea   : > { %v3807_v6 = vpop.permute.xlu0 %771 }
 0x2eb   : > { %vm794_vm4 = vcmp.eq.s32.totalorder %v3290_v49, %v3807_v6 }
 0x2ee   : > { %v3827_v18 = vpop.permute.xlu0 %780 }
 0x2f0   : > { %1453 = vadd.xlane.f32.xlu1 %v1452_v13  ;;  %v2435_v13 = vsel %vm578_vm5, 1.0, %v3049_v15  ;;  %vm903_vm5 = vcmp.eq.s32.totalorder %v3290_v49, %v3722_v20 }
 0x2f6   : > { %v3770_v60 = vpop.xlane.xlu1 %1447 }
 0x2f7   : > { %4735 = vst [vmem:[#allocation82_spill] sm:$0xff] %v3770_v60  ;;  %v2467_v60 = vsel %vm786_vm6, 1.0, %v3049_v15  ;;  %vm1349_vm6 = vcmp.eq.s32.totalorder %v3290_v49, %v3741_v43 }
 0x2f8   : > { %v2550_v43 = vsel %vm1349_vm6, 1.0, %v3049_v15 }
 0x2fa   : > { %v3774_v37 = vpop.permute.xlu1 %1183 }
 0x2fb   : > { %4736 = vst [vmem:[#allocation83_spill] sm:$0xff] %v3774_v37  ;;  %v722_v37 = vadd.f32 %v2451_v54, %v2435_v13 }
 0x2fd   : > { %v834_v2 = vadd.f32 %v2467_v60, %v722_v37  ;;  %v2454_v60 = vsel %vm677_vm8, 1.0, %v3049_v15  ;;  %vm1127_vm8 = vcmp.eq.s32.totalorder %v3290_v49, %v3768_v24 }
 0x2fe   : > { %v3784_v57 = vpop.permute.xlu1 %1186 }
 0x2ff   : > { %v946_v36 = vadd.f32 %v2483_v53, %v834_v2  ;;  %v2547_v53 = vsel %vm1346_vm13, 1.0, %v3049_v15  ;;  %vm792_vm13 = vcmp.eq.s32.totalorder %v3290_v49, %v3793_v48 }
 0x301   : > { %735 = vperm.xlu1 %2858, %v3636_v63   ;;  %v1058_v37 = vadd.f32 %v2499_v50, %v946_v36 }
 0x302   : > { %v3789_v52 = vpop.permute.xlu1 %1189 }
 0x303   : > { %v1170_v13 = vadd.f32 %v2515_v17, %v1058_v37  ;;  %v2930_v37 = vpop.eup %2929  ;;  %v2518_v17 = vsel %vm1125_vm2, 1.0, %v3049_v15 }
 0x304   : > { %v2932_v20 = vpop.eup %2931 }
 0x305   : > { %738 = vperm.xlu1 %2858, %v3644_v10   ;;  %v2438_v10 = vsel %vm581_vm9, 1.0, %v3049_v15 }
 0x306   : > { %v3799_v54 = vpop.permute.xlu1 %1192  ;;  %v725_v7 = vadd.f32 %v2454_v60, %v2438_v10  ;;  %v2502_v60 = vsel %vm1013_vm15, 1.0, %v3049_v15 }
 0x309   : > { %741 = vperm.xlu1 %2858, %v3650_v5   ;;  %v837_v5 = vadd.f32 %v2470_v26, %v725_v7  ;;  %v3846_v26 = vpop.permute.xlu0 %889 }
 0x30a   : > { %v1196_v63 = vpop.permute.xlu1 %1195 }
 0x30b   : > { %vm1234_vm14 = vcmp.eq.s32.totalorder %v3290_v49, %v1196_v63  ;;  %v949_v36 = vadd.f32 %v2486_v61, %v837_v5  ;;  %v2488_v63 = vsel %vm903_vm5, 1.0, %v3049_v15  ;;  %v2504_v61 = vsel %vm1015_vm0, 1.0, %v3049_v15 }
 0x30c   : > { %v2531_v8 = vsel %vm1234_vm14, 1.0, %v3049_v15  ;;  %vm670_vm0 = vcmp.eq.s32.totalorder %v3290_v49, %v3371_v30 }
 0x30d   : > { %v1282_v34 = vadd.f32 %v2531_v8, %v1170_v13  ;;  %744 = vperm.xlu1 %2858, %v3656_v16   ;;  %v1061_v10 = vadd.f32 %v2502_v60, %v949_v36  ;;  %v839_v13 = vadd.f32 %v2472_v46, %v727_v3  ;;  %v1323_v8 = vpop.permute.xlu0 %1322 }
 0x30e   : > { %v3825_v2 = vpop.permute.xlu1 %1198  ;;  %vm1351_vm9 = vcmp.eq.s32.totalorder %v3290_v49, %v1323_v8 }
 0x30f   : > { %v1394_v50 = vadd.f32 %v2547_v53, %v1282_v34  ;;  %v1173_v19 = vadd.f32 %v2518_v17, %v1061_v10  ;;  %v951_v5 = vadd.f32 %v2488_v63, %v839_v13  ;;  %v2520_v53 = vsel %vm1127_vm8, 1.0, %v3049_v15  ;;  %v2934_v10 = vpop.eup %2933 }
 0x310   : > { %v2552_v60 = vsel %vm1351_vm9, 1.0, %v3049_v15  ;;  %v2473_v63 = vsel %vm792_vm13, 1.0, %v3049_v15  ;;  %vm671_vm8 = vcmp.eq.s32.totalorder %v3290_v49, %v3377_v38  ;;  %vm897_vm9 = vcmp.eq.s32.totalorder %v3290_v49, %v3618_v22 }
 0x311   : > { %750 = vperm.xlu1 %2858, %v3669_v55   ;;  %v3838_v16 = vmul.f32 %v2930_v37, %v1394_v50  ;;  %v1063_v36 = vadd.f32 %v2504_v61, %v951_v5  ;;  %v2460_v5 = vsel %vm683_vm1, 1.0, %v3049_v15  ;;  %v3970_v38 = vsel %vm671_vm8, 1.0, %v3049_v15 }
 0x312   : > { %v3841_v56 = vpop.permute.xlu1 %1201 }
 0x313   : > { %v1175_v50 = vadd.f32 %v2520_v53, %v1063_v36 }
 0x315   : > { %753 = vperm.xlu1 %2858, %v3673_v12  }
 0x316   : > { %v1205_v55 = vpop.permute.xlu1 %1204 }
 0x317   : > { %vm1237_vm7 = vcmp.eq.s32.totalorder %v3290_v49, %v1205_v55  ;;  %v2441_v55 = vsel %vm584_vm11, 1.0, %v3049_v15  ;;  %vm672_vm11 = vcmp.eq.s32.totalorder %v3290_v49, %v3388_v44  ;;  %v4740_v44 = vld [vmem:[#allocation8_spill] sm:$0xff] }
 0x318   : > { %v2534_v7 = vsel %vm1237_vm7, 1.0, %v3049_v15  ;;  %vm574_vm7 = vcmp.eq.s32.totalorder %v3290_v49, %v3381_v40  ;;  %v4738_v40 = vld [vmem:[#allocation6_spill] sm:$0xff] }
 0x319   : > { %v1285_v12 = vadd.f32 %v2534_v7, %v1173_v19  ;;  %759 = vperm.xlu1 %2858, %v3704_v0   ;;  %v2457_v19 = vsel %vm680_vm12, 1.0, %v3049_v15  ;;  %v2431_v30 = vsel %vm574_vm7, 1.0, %v3049_v15  ;;  %vm1118_vm12 = vcmp.eq.s32.totalorder %v3290_v49, %v3396_v47 }
 0x31a   : > { %v3864_v31 = vpop.permute.xlu1 %1207  ;;  %v728_v28 = vadd.f32 %v2457_v19, %v2441_v55  ;;  %v4742_v19 = vld [vmem:[#allocation63_spill] sm:$0xff] }
 0x31b   : > { %v1397_v34 = vadd.f32 %v2550_v43, %v1285_v12  ;;  %v2973_v12 = vld [vmem:[%s3156_s17 + $0x60] sm:$0xff] }
 0x31c   : > { %v840_v13 = vadd.f32 %v2473_v63, %v728_v28 }
 0x31d   : > { %768 = vperm.xlu1 %2858, %v3738_v23   ;;  %v3869_v24 = vmul.f32 %v2932_v20, %v1397_v34 }
 0x31e   : > { %v1211_v0 = vpop.permute.xlu1 %1210 }
 0x31f   : > { %vm1239_vm10 = vcmp.eq.s32.totalorder %v3290_v49, %v1211_v0  ;;  %v2475_v0 = vsel %vm794_vm4, 1.0, %v3049_v15 }
 0x320   : > { %v2536_v37 = vsel %vm1239_vm10, 1.0, %v3049_v15  ;;  %vm577_vm10 = vcmp.eq.s32.totalorder %v3290_v49, %v3383_v41  ;;  %v4739_v41 = vld [vmem:[#allocation54_spill] sm:$0xff] }
 0x321   : > { %v1287_v25 = vadd.f32 %v2536_v37, %v1175_v50  ;;  %774 = vperm.xlu1 %2858, %v3875_v14   ;;  %v2434_v22 = vsel %vm577_vm10, 1.0, %v3049_v15 }
 0x322   : > { %v878_v17 = vpop.permute.xlu1 %877 }
 0x323   : > { %v1399_v33 = vadd.f32 %v2552_v60, %v1287_v25  ;;  %vm904_vm14 = vcmp.eq.s32.totalorder %v3290_v49, %v878_v17  ;;  %v3933_v25 = vld [vmem:[%s3156_s17 + $0x70] sm:$0xff]  ;;  %v2449_v17 = vsel %vm672_vm11, 1.0, %v3049_v15 }
 0x324   : > { %v2489_v7 = vsel %vm904_vm14, 1.0, %v3049_v15  ;;  %vm1119_vm14 = vcmp.eq.s32.totalorder %v3290_v49, %v4738_v40  ;;  %v4755_v40 = vld [vmem:[#allocation28_spill] sm:$0xff] }
 0x325   : > { %v3882_v3 = vmul.f32 %v2934_v10, %v1399_v33  ;;  %2859 = vset.pattern.permute.xlu1 %v4686_v4  ;;  %v952_v43 = vadd.f32 %v2489_v7, %v840_v13  ;;  %v3939_v10 = vld [vmem:[%s3156_s17 + $0x78] sm:$0xff]  ;;  %v3994_v33 = vsel %vm1118_vm12, 1.0, %v3049_v15  ;;  %v4000_v28 = vsel %vm1119_vm14, 1.0, %v3049_v15  ;;  %v4743_v7 = vld [vmem:[#allocation23_spill] sm:$0xff]  ;;  %v4744_v13 = vld [vmem:[#allocation65_spill] sm:$0xff] }
 0x326   : > { %1213 = vperm.xlu1 %2859, %v3732_v11   ;;  %v3886_v46 = vpop.permute.xlu1 %880  ;;  %vm678_vm4 = vcmp.eq.s32.totalorder %v3290_v49, %v4744_v13 }
 0x32a   : > { %1216 = vperm.xlu1 %2859, %v3738_v23  }
 0x32b   : > { %v3894_v58 = vpop.permute.xlu1 %1319 }
 0x32e   : > { %2860 = vset.pattern.permute.xlu1 %v4712_v51 }
 0x32f   : > { %883 = vperm.xlu1 %2860, %v2973_v12  }
 0x330   : > { %v990_v20 = vpop.permute.xlu1 %989 }
 0x331   : > { %vm1016_vm15 = vcmp.eq.s32.totalorder %v3290_v49, %v990_v20  ;;  %v4745_v20 = vld [vmem:[#allocation24_spill] sm:$0xff] }
 0x332   : > { %v2505_v48 = vsel %vm1016_vm15, 1.0, %v3049_v15  ;;  %vm1120_vm15 = vcmp.eq.s32.totalorder %v3290_v49, %v4739_v41  ;;  %v4756_v41 = vld [vmem:[#allocation78_spill] sm:$0xff] }
 0x333   : > { %v1064_v61 = vadd.f32 %v2505_v48, %v952_v43  ;;  %886 = vperm.xlu1 %2860, %v3875_v14   ;;  %v4003_v63 = vsel %vm1120_vm15, 1.0, %v3049_v15  ;;  %v4746_v43 = vld [vmem:[#allocation66_spill] sm:$0xff]  ;;  %v4747_v48 = vld [vmem:[#allocation25_spill] sm:$0xff]  ;;  %vm579_vm14 = vcmp.eq.s32.totalorder %v3290_v49, %v4756_v41 }
 0x334   : > { %v3903_v8 = vpop.permute.xlu1 %992 }
 0x337   : > { %2861 = vset.pattern.permute.xlu1 %v4715_v59 }
 0x338   : > { %1325 = vperm.xlu1 %2861, %v3732_v11   ;;  %v2443_v11 = vsel %vm586_vm3, 1.0, %v3049_v15  ;;  %vm675_vm3 = vcmp.eq.s32.totalorder %v3290_v49, %v4743_v7 }
 0x339   : > { %v567_v34 = vpop.permute.xlu1 %566 }
 0x33a   : > { %vm587_vm2 = vcmp.eq.s32.totalorder %v3290_v49, %v567_v34 }
 0x33b   : > { %v2444_v53 = vsel %vm587_vm2, 1.0, %v3049_v15  ;;  %vm676_vm2 = vcmp.eq.s32.totalorder %v3290_v49, %v4742_v19 }
 0x33c   : > { %v3914_v36 = vadd.f32 %v2460_v5, %v2444_v53  ;;  %1328 = vperm.xlu1 %2861, %v3738_v23   ;;  %v2453_v34 = vsel %vm676_vm2, 1.0, %v3049_v15  ;;  %v4748_v53 = vld [vmem:[#allocation26_spill] sm:$0xff] }
 0x33e   : > { %v660_v32 = vpop.permute.xlu1 %659 }
 0x33f   : > { %vm682_vm5 = vcmp.eq.s32.totalorder %v3290_v49, %v660_v32  ;;  %v2452_v32 = vsel %vm675_vm3, 1.0, %v3049_v15 }
 0x340   : > { %v2459_v62 = vsel %vm682_vm5, 1.0, %v3049_v15  ;;  %2863 = vset.pattern.permute.xlu1 %v4718_v35  ;;  %vm1121_vm5 = vcmp.eq.s32.totalorder %v3290_v49, %v4745_v20  ;;  %v4758_v20 = vld [vmem:[#allocation37_spill] sm:$0xff] }
 0x341   : > { %v730_v50 = vadd.f32 %v2459_v62, %v2443_v11  ;;  %998 = vperm.xlu1 %2863, %v3875_v14   ;;  %v4749_v62 = vld [vmem:[#allocation27_spill] sm:$0xff] }
 0x342   : > { %vm1007_vm7 = vcmp.eq.s32.totalorder %v3290_v49, %v4749_v62  ;;  %v4759_v62 = vld [vmem:[#allocation40_spill] sm:$0xff] }
 0x343   : > { %v1102_v23 = vpop.permute.xlu1 %1101  ;;  %v3925_v37 = vadd.f32 %v2475_v0, %v730_v50  ;;  %v4027_v0 = vsel %vm678_vm4, 1.0, %v3049_v15  ;;  %v4750_v50 = vld [vmem:[#allocation70_spill] sm:$0xff]  ;;  %vm1342_vm2 = vcmp.eq.s32.totalorder %v3290_v49, %v4759_v62 }
 0x344   : > { %vm1128_vm6 = vcmp.eq.s32.totalorder %v3290_v49, %v1102_v23  ;;  %vm1008_vm8 = vcmp.eq.s32.totalorder %v3290_v49, %v4750_v50  ;;  %v4035_v23 = vsel %vm1121_vm5, 1.0, %v3049_v15 }
 0x345   : > { %v2521_v6 = vsel %vm1128_vm6, 1.0, %v3049_v15  ;;  %2864 = vset.pattern.permute.xlu1 %v4721_v21  ;;  %v1457_v21 = vmax.f32 %v3394_v45, 1.0  ;;  %vm681_vm6 = vcmp.eq.s32.totalorder %v3290_v49, %v4746_v43  ;;  %v1463_v43 = vmax.f32 %v4758_v20, 1.0  ;;  %v4763_v20 = vld [vmem:[#allocation45_spill] sm:$0xff] }
 0x346   : > { %v3930_v60 = vadd.f32 %v2521_v6, %v1064_v61  ;;  %569 = vperm.xlu1 %2864, %v3933_v25   ;;  %v1461_v61 = vmax.f32 %v4747_v48, 1.0  ;;  %v4751_v6 = vld [vmem:[#allocation31_spill] sm:$0xff] }
 0x347   : > { %v3989_v47 = vpop.permute.xlu1 %1104 }
 0x34a   : > { %2866 = vset.pattern.permute.xlu1 %v4723_v1  ;;  %v1456_v1 = vmax.f32 %v3386_v42, 1.0  ;;  %v3981_v42 = vsel %vm897_vm9, 1.0, %v3049_v15  ;;  %vm580_vm9 = vcmp.eq.s32.totalorder %v3290_v49, %v4751_v6 }
 0x34b   : > { %665 = vperm.xlu1 %2866, %v3933_v25  }
 0x34c   : > { %2935 = vrcp.f32 %v1456_v1  ;;  %v4752_v1 = vld [vmem:[#allocation75_spill] sm:$0xff] }
 0x34d   : > { %2937 = vrcp.f32 %v1457_v21  ;;  %vm575_vm10 = vcmp.eq.s32.totalorder %v3290_v49, %v4752_v1 }
 0x34f   : > { %668 = vperm.xlu1 %2866, %v3939_v10  }
 0x353   : > { %2867 = vset.pattern.permute.xlu1 %v4724_v9 }
 0x354   : > { %1110 = vperm.xlu1 %2867, %v3875_v14  }
 0x358   : > { %2868 = vset.pattern.permute.xlu1 %v4727_v29  ;;  %v1455_v29 = vmax.f32 %v3369_v27, 1.0  ;;  %v2447_v27 = vsel %vm670_vm0, 1.0, %v3049_v15  ;;  %vm1006_vm0 = vcmp.eq.s32.totalorder %v3290_v49, %v4748_v53  ;;  %v2436_v53 = vsel %vm579_vm14, 1.0, %v3049_v15 }
 0x359   : > { %777 = vperm.xlu1 %2868, %v3933_v25   ;;  %v718_v45 = vadd.f32 %v2447_v27, %v2431_v30  ;;  %v2495_v21 = vsel %vm1006_vm0, 1.0, %v3049_v15  ;;  %v4049_v27 = vpop.eup %2935  ;;  %v2496_v30 = vsel %vm1007_vm7, 1.0, %v3049_v15  ;;  %vm1344_vm0 = vcmp.eq.s32.totalorder %v3290_v49, %v4763_v20 }
 0x35a   : > { %2939 = vrcp.f32 %v1455_v29  ;;  %v4753_v29 = vld [vmem:[#allocation72_spill] sm:$0xff] }
 0x35b   : > { %vm1011_vm11 = vcmp.eq.s32.totalorder %v3290_v49, %v4753_v29  ;;  %v4760_v29 = vld [vmem:[#allocation42_spill] sm:$0xff] }
 0x35c   : > { %v4070_v7 = vsel %vm1011_vm11, 1.0, %v3049_v15  ;;  %vm1343_vm3 = vcmp.eq.s32.totalorder %v3290_v49, %v4760_v29 }
 0x35d   : > { %2869 = vset.pattern.permute.xlu1 %v4686_v4 }
 0x35e   : > { %1219 = vperm.xlu1 %2869, %v2973_v12  }
 0x362   : > { %1222 = vperm.xlu1 %2869, %v3875_v14   ;;  %v4741_v14 = vld [vmem:[#allocation55_spill] sm:$0xff] }
 0x363   : > { %vm1123_vm1 = vcmp.eq.s32.totalorder %v3290_v49, %v4741_v14  ;;  %v2432_v14 = vsel %vm575_vm10, 1.0, %v3049_v15 }
 0x364   : > { %v719_v1 = vadd.f32 %v3970_v38, %v2432_v14  ;;  %v2543_v38 = vsel %vm1342_vm2, 1.0, %v3049_v15  ;;  %v2544_v14 = vsel %vm1343_vm3, 1.0, %v3049_v15 }
 0x366   : > { %2872 = vset.pattern.permute.xlu1 %v4712_v51  ;;  %v1458_v51 = vmax.f32 %v3379_v39, 1.0  ;;  %v4737_v39 = vld [vmem:[#allocation61_spill] sm:$0xff] }
 0x367   : > { %892 = vperm.xlu1 %2872, %v3939_v10   ;;  %vm673_vm13 = vcmp.eq.s32.totalorder %v3290_v49, %v4737_v39  ;;  %v4053_v39 = vsel %vm1008_vm8, 1.0, %v3049_v15 }
 0x368   : > { %2941 = vrcp.f32 %v1458_v51  ;;  %v2450_v55 = vsel %vm673_vm13, 1.0, %v3049_v15  ;;  %v4754_v51 = vld [vmem:[#allocation77_spill] sm:$0xff]  ;;  %vm1009_vm13 = vcmp.eq.s32.totalorder %v3290_v49, %v4755_v40 }
 0x369   : > { %v4017_v5 = vadd.f32 %v2450_v55, %v2434_v22  ;;  %vm576_vm12 = vcmp.eq.s32.totalorder %v3290_v49, %v4754_v51  ;;  %v4757_v55 = vld [vmem:[#allocation60_spill] sm:$0xff] }
 0x36a   : > { %vm894_vm15 = vcmp.eq.s32.totalorder %v3290_v49, %v4757_v55  ;;  %v2433_v13 = vsel %vm576_vm12, 1.0, %v3049_v15  ;;  %v4762_v55 = vld [vmem:[#allocation83_spill] sm:$0xff] }
 0x36b   : > { %2873 = vset.pattern.permute.xlu1 %v4715_v59  ;;  %v2479_v51 = vsel %vm894_vm15, 1.0, %v3049_v15  ;;  %v720_v41 = vadd.f32 %v2449_v17, %v2433_v13  ;;  %vm1232_vm15 = vcmp.eq.s32.totalorder %v3290_v49, %v3789_v52 }
 0x36c   : > { %1331 = vperm.xlu1 %2873, %v2973_v12   ;;  %v4010_v12 = vsel %vm1123_vm1, 1.0, %v3049_v15 }
 0x370   : > { %2875 = vset.pattern.permute.xlu1 %v4718_v35  ;;  %v1460_v35 = vmax.f32 %v4740_v44, 1.0  ;;  %v4059_v44 = vpop.eup %2937 }
 0x371   : > { %1001 = vperm.xlu1 %2875, %v3933_v25   ;;  %v4067_v19 = vpop.eup %2939 }
 0x372   : > { %2943 = vrcp.f32 %v1460_v35  ;;  %v2437_v35 = vsel %vm580_vm9, 1.0, %v3049_v15 }
 0x373   : > { %2945 = vrcp.f32 %v1461_v61  ;;  %v4077_v61 = vsel %vm1009_vm13, 1.0, %v3049_v15  ;;  %v4084_v6 = vadd.f32 %v2453_v34, %v2437_v35  ;;  %v4096_v34 = vadd.f32 %v2452_v32, %v2436_v53  ;;  %v4764_v32 = vld [vmem:[#allocation47_spill] sm:$0xff] }
 0x374   : > { %2947 = vrcp.f32 %v1463_v43  ;;  %vm1345_vm7 = vcmp.eq.s32.totalorder %v3290_v49, %v4764_v32  ;;  %v4765_v43 = vld [vmem:[#allocation51_spill] sm:$0xff]  ;;  %vm1231_vm13 = vcmp.eq.s32.totalorder %v3290_v49, %v3784_v57 }
 0x375   : > { %1004 = vperm.xlu1 %2875, %v3939_v10   ;;  %v4082_v50 = vpop.eup %2941  ;;  %vm1347_vm8 = vcmp.eq.s32.totalorder %v3290_v49, %v4765_v43  ;;  %v2528_v43 = vsel %vm1231_vm13, 1.0, %v3049_v15  ;;  %v4770_v57 = vld [vmem:[#allocation67_spill] sm:$0xff] }
 0x376   : > { %vm899_vm2 = vcmp.eq.s32.totalorder %v3290_v49, %v4770_v57 }
 0x379   : > { %2876 = vset.pattern.permute.xlu1 %v4724_v9  ;;  %v4023_v11 = vpop.xlane.xlu1 %1453  ;;  %v4038_v9 = vsel %vm681_vm6, 1.0, %v3049_v15  ;;  %vm1230_vm6 = vcmp.eq.s32.totalorder %v3290_v49, %v4762_v55  ;;  %v4143_v55 = vsel %vm1345_vm7, 1.0, %v3049_v15 }
 0x37a   : > { %1116 = vperm.xlu1 %2876, %v3939_v10   ;;  %v2527_v29 = vsel %vm1230_vm6, 1.0, %v3049_v15 }
 0x37d   : > { %v736_v22 = vpop.permute.xlu1 %735 }
 0x37e   : > { %vm782_vm1 = vcmp.eq.s32.totalorder %v3290_v49, %v736_v22  ;;  %2877 = vset.pattern.permute.xlu1 %v4686_v4  ;;  %v4761_v22 = vld [vmem:[#allocation62_spill] sm:$0xff] }
 0x37f   : > { %v2463_v48 = vsel %vm782_vm1, 1.0, %v3049_v15  ;;  %1225 = vperm.xlu1 %2877, %v3933_v25   ;;  %vm895_vm4 = vcmp.eq.s32.totalorder %v3290_v49, %v4761_v22  ;;  %v4115_v53 = vpop.eup %2943 }
 0x380   : > { %v830_v4 = vadd.f32 %v2463_v48, %v718_v45 }
 0x381   : > { %v739_v40 = vpop.permute.xlu1 %738 }
 0x382   : > { %v942_v45 = vadd.f32 %v2479_v51, %v830_v4  ;;  %vm783_vm5 = vcmp.eq.s32.totalorder %v3290_v49, %v739_v40  ;;  %v4767_v4 = vld [vmem:[#allocation52_spill] sm:$0xff] }
 0x383   : > { %v2464_v35 = vsel %vm783_vm5, 1.0, %v3049_v15  ;;  %2879 = vset.pattern.permute.xlu1 %v4715_v59  ;;  %v2480_v59 = vsel %vm895_vm4, 1.0, %v3049_v15  ;;  %vm1012_vm11 = vcmp.eq.s32.totalorder %v3290_v49, %v4767_v4  ;;  %vm1233_vm5 = vcmp.eq.s32.totalorder %v3290_v49, %v3799_v54 }
 0x384   : > { %v1054_v17 = vadd.f32 %v2495_v21, %v942_v45  ;;  %v831_v13 = vadd.f32 %v2464_v35, %v719_v1  ;;  %1337 = vperm.xlu1 %2879, %v3933_v25   ;;  %v4766_v21 = vld [vmem:[#allocation64_spill] sm:$0xff]  ;;  %v4768_v1 = vld [vmem:[#allocation53_spill] sm:$0xff]  ;;  %v4133_v45 = vpop.eup %2945  ;;  %v2545_v35 = vsel %vm1344_vm0, 1.0, %v3049_v15  ;;  %v2501_v32 = vsel %vm1012_vm11, 1.0, %v3049_v15 }
 0x385   : > { %v742_v48 = vpop.permute.xlu1 %741  ;;  %vm896_vm9 = vcmp.eq.s32.totalorder %v3290_v49, %v4766_v21  ;;  %vm582_vm12 = vcmp.eq.s32.totalorder %v3290_v49, %v4768_v1  ;;  %v4769_v1 = vld [vmem:[#allocation56_spill] sm:$0xff] }
 0x386   : > { %v1166_v25 = vadd.f32 %v3994_v33, %v1054_v17  ;;  %v943_v62 = vadd.f32 %v2480_v59, %v831_v13  ;;  %vm784_vm10 = vcmp.eq.s32.totalorder %v3290_v49, %v742_v48  ;;  %v2439_v17 = vsel %vm582_vm12, 1.0, %v3049_v15 }
 0x387   : > { %v2465_v51 = vsel %vm784_vm10, 1.0, %v3049_v15  ;;  %v726_v4 = vadd.f32 %v4027_v0, %v2439_v17  ;;  %vm1124_vm1 = vcmp.eq.s32.totalorder %v3290_v49, %v4769_v1  ;;  %v2529_v0 = vsel %vm1232_vm15, 1.0, %v3049_v15  ;;  %v4773_v17 = vld [vmem:[#allocation79_spill] sm:$0xff] }
 0x388   : > { %v1055_v33 = vadd.f32 %v2496_v30, %v943_v62  ;;  %v832_v40 = vadd.f32 %v2465_v51, %v720_v41  ;;  %1340 = vperm.xlu1 %2879, %v3939_v10   ;;  %v1278_v22 = vadd.f32 %v2527_v29, %v1166_v25  ;;  %v4149_v30 = vsel %vm1347_vm8, 1.0, %v3049_v15  ;;  %v2905_v62 = vld [vmem:[%s4611_s3 + $0x78] sm:$0xff]  }
 0x389   : > { %v2481_v10 = vsel %vm896_vm9, 1.0, %v3049_v15  ;;  %v745_v41 = vpop.permute.xlu1 %744  ;;  %2640 = vmatprep.subr.bf16.mxu1 %v2905_v62  ;;  %vm585_vm0 = vcmp.eq.s32.totalorder %v3290_v49, %v4773_v17  ;;  %vm1235_vm8 = vcmp.eq.s32.totalorder %v3290_v49, %v3825_v2  ;;  %v4774_v62 = vld [vmem:[#allocation76_spill] sm:$0xff]  ;;  %v4775_v1 = vmov 0  }
 0x38a   : > { %v1167_v13 = vadd.f32 %v4000_v28, %v1055_v33  ;;  %v944_v20 = vadd.f32 %v2481_v10, %v832_v40  ;;  %vm785_vm14 = vcmp.eq.s32.totalorder %v3290_v49, %v745_v41  ;;  %v1390_v48 = vadd.f32 %v2543_v38, %v1278_v22  ;;  %v4771_v38 = vld [vmem:[#allocation68_spill] sm:$0xff]  ;;  %v4189_v40 = vpop.eup %2947 }
 0x38b   : > { %v2466_v59 = vsel %vm785_vm14, 1.0, %v3049_v15  ;;  %vm900_vm3 = vcmp.eq.s32.totalorder %v3290_v49, %v4771_v38  ;;  %v2484_v41 = vsel %vm899_vm2, 1.0, %v3049_v15  ;;  %vm1014_vm9 = vcmp.eq.s32.totalorder %v3290_v49, %v4774_v62 }
 0x38c   : > { %v1056_v28 = vadd.f32 %v4053_v39, %v944_v20  ;;  %v833_v21 = vadd.f32 %v2466_v59, %v4017_v5  ;;  %v1279_v25 = vadd.f32 %v2528_v43, %v1167_v13  ;;  %v1487_v33 = vmul.f32 %v4067_v19, %v1390_v48  ;;  %v4772_v19 = vld [vmem:[#allocation71_spill] sm:$0xff] }
 0x38d   : > { %v751_v52 = vpop.permute.xlu1 %750  ;;  %vm902_vm6 = vcmp.eq.s32.totalorder %v3290_v49, %v4772_v19  ;;  %v2485_v20 = vsel %vm900_vm3, 1.0, %v3049_v15  ;;  %v2530_v43 = vsel %vm1233_vm5, 1.0, %v3049_v15  ;;  %v2442_v54 = vsel %vm585_vm0, 1.0, %v3049_v15 }
 0x38e   : > { %v1168_v39 = vadd.f32 %v4003_v63, %v1056_v28  ;;  %v945_v5 = vadd.f32 %v3981_v42, %v833_v21  ;;  %vm787_vm4 = vcmp.eq.s32.totalorder %v3290_v49, %v751_v52  ;;  %v1391_v29 = vadd.f32 %v2544_v14, %v1279_v25  ;;  %v4776_v52 = vld [vmem:[#allocation73_spill] sm:$0xff] }
 0x38f   : > { %v2468_v51 = vsel %vm787_vm4, 1.0, %v3049_v15  ;;  %v2517_v14 = vsel %vm1124_vm1, 1.0, %v3049_v15  ;;  %v2487_v25 = vsel %vm902_vm6, 1.0, %v3049_v15  ;;  %vm1348_vm11 = vcmp.eq.s32.totalorder %v3290_v49, %v4776_v52 }
 0x390   : > { %v1057_v22 = vadd.f32 %v4077_v61, %v945_v5  ;;  %v835_v63 = vadd.f32 %v2468_v51, %v4096_v34  ;;  %v1488_v42 = vmul.f32 %v4049_v27, %v1391_v29  ;;  %v1280_v10 = vadd.f32 %v2529_v0, %v1168_v39 }
 0x391   : > { %v754_v61 = vpop.permute.xlu1 %753  ;;  %v2532_v39 = vsel %vm1235_vm8, 1.0, %v3049_v15  ;;  %vm1236_vm12 = vcmp.eq.s32.totalorder %v3290_v49, %v3841_v56  ;;  %v729_v51 = vadd.f32 %v4038_v9, %v2442_v54  ;;  %vm905_vm14 = vcmp.eq.s32.totalorder %v3290_v49, %v3886_v46  ;;  %v2911_v54 = vld [vmem:[%s4611_s3 + $0x60] sm:$0xff]  }
 0x392   : > { %v1169_v27 = vadd.f32 %v4035_v23, %v1057_v22  ;;  %v947_v34 = vadd.f32 %v2484_v41, %v835_v63  ;;  %vm788_vm7 = vcmp.eq.s32.totalorder %v3290_v49, %v754_v61  ;;  %v1519_v13 = vpack.c.bf16 %v1488_v42, %v1487_v33  ;;  %v4777_v33 = vld [vmem:[#allocation80_spill] sm:$0xff] }
 0x393   : > { %v2469_v59 = vsel %vm788_vm7, 1.0, %v3049_v15  ;;  %v1392_v48 = vadd.f32 %v2545_v35, %v1280_v10  ;;  %vm1126_vm13 = vcmp.eq.s32.totalorder %v3290_v49, %v4777_v33  ;;  %vm1238_vm1 = vcmp.eq.s32.totalorder %v3290_v49, %v3864_v31 }
 0x394   : > { %v1059_v23 = vadd.f32 %v4070_v7, %v947_v34  ;;  %v836_v28 = vadd.f32 %v2469_v59, %v4084_v6  ;;  %1784 = vmatmul.mubr.bf16.gmra.mxu0 %v1519_v13  ;;  %v1281_v21 = vadd.f32 %v2530_v43, %v1169_v27  ;;  %vm1017_vm2 = vcmp.eq.s32.totalorder %v3290_v49, %v3903_v8  ;;  %v2907_v59 = vld [vmem:[%s4611_s3 + $0x70] sm:$0xff]  }
 0x395   : > { %v760_v35 = vpop.permute.xlu1 %759  ;;  %1791 = vmatprep.mubr.bf16.mxu0 %v4775_v1  ;;  %v1489_v7 = vmul.f32 %v4059_v44, %v1392_v48  ;;  %v2519_v41 = vsel %vm1126_vm13, 1.0, %v3049_v15  ;;  %vm1350_vm3 = vcmp.eq.s32.totalorder %v3290_v49, %v3894_v58  ;;  %v2535_v34 = vsel %vm1238_vm1, 1.0, %v3049_v15 }
 0x396   : > { %v1171_v6 = vadd.f32 %v4010_v12, %v1059_v23  ;;  %v948_v57 = vadd.f32 %v2485_v20, %v836_v28  ;;  %vm790_vm10 = vcmp.eq.s32.totalorder %v3290_v49, %v760_v35  ;;  %v1393_v38 = vadd.f32 %v4143_v55, %v1281_v21  ;;  %v2906_v20 = vld [vmem:[%s4611_s3 + $0x38] sm:$0xff]   ;;  %v2908_v28 = vld [vmem:[%s4611_s3 + $0x30] sm:$0xff]   ;;  %v2909_v21 = vld [vmem:[%s4611_s3 + $0x68] sm:$0xff]  }
 0x397   : > { %v2471_v44 = vsel %vm790_vm10, 1.0, %v3049_v15  ;;  %v2503_v55 = vsel %vm1014_vm9, 1.0, %v3049_v15  ;;  %v2506_v13 = vsel %vm1017_vm2, 1.0, %v3049_v15  ;;  %v2551_v48 = vsel %vm1350_vm3, 1.0, %v3049_v15  ;;  %v4778_v35 = vld [vmem:[#allocation57_spill] sm:$0xff] }
 0x398   : > { %v1060_v5 = vadd.f32 %v2501_v32, %v948_v57  ;;  %v838_v12 = vadd.f32 %v2471_v44, %v726_v4  ;;  %v1490_v29 = vmul.f32 %v4082_v50, %v1393_v38  ;;  %v1283_v0 = vadd.f32 %v2532_v39, %v1171_v6  ;;  %v4780_v38 = vld [vmem:[#allocation74_spill] sm:$0xff]  ;;  %v2913_v39 = vld [vmem:[%s4611_s3 + $0x58] sm:$0xff]  }
 0x399   : > { %v769_v2 = vpop.permute.xlu1 %768  ;;  %v2533_v4 = vsel %vm1236_vm12, 1.0, %v3049_v15  ;;  %vm1018_vm4 = vcmp.eq.s32.totalorder %v3290_v49, %v4780_v38  ;;  %vm1129_vm0 = vcmp.eq.s32.totalorder %v3290_v49, %v3989_v47 }
 0x39a   : > { %v1172_v56 = vadd.f32 %v2517_v14, %v1060_v5  ;;  %v950_v32 = vadd.f32 %v2487_v25, %v838_v12  ;;  %vm793_vm15 = vcmp.eq.s32.totalorder %v3290_v49, %v769_v2  ;;  %v1520_v50 = vpack.c.bf16 %v1490_v29, %v1489_v7  ;;  %v4779_v7 = vld [vmem:[#allocation58_spill] sm:$0xff] }
 0x39b   : > { %v2474_v22 = vsel %vm793_vm15, 1.0, %v3049_v15  ;;  %v1395_v9 = vadd.f32 %v4149_v30, %v1283_v0  ;;  %v2549_v14 = vsel %vm1348_vm11, 1.0, %v3049_v15  ;;  %v2490_v30 = vsel %vm905_vm14, 1.0, %v3049_v15  ;;  %v2914_v0 = vld [vmem:[%s4611_s3 + $0x18] sm:$0xff]  }
 0x39c   : > { %v1062_v63 = vadd.f32 %v2503_v55, %v950_v32  ;;  %v841_v42 = vadd.f32 %v2474_v22, %v729_v51  ;;  %1792 = vmatmul.mubr.bf16.gmra.mxu0 %v1520_v50  ;;  %v1284_v10 = vadd.f32 %v2533_v4, %v1172_v56  ;;  %v1465_v6 = vmax.f32 %v4779_v7, 1.0 }
 0x39d   : > { %v4275_v8 = vpop.permute.xlu1 %774  ;;  %v1492_v19 = vmul.f32 %v4115_v53, %v1395_v9  ;;  %v2507_v5 = vsel %vm1018_vm4, 1.0, %v3049_v15  ;;  %v2522_v51 = vsel %vm1129_vm0, 1.0, %v3049_v15  ;;  %vm797_vm11 = vcmp.eq.s32.totalorder %v3290_v49, %v3827_v18  ;;  %v2916_v18 = vld [vmem:[%s4611_s3 + $0x10] sm:$0xff]  }
 0x39e   : > { %v1174_v17 = vadd.f32 %v2519_v41, %v1062_v63  ;;  %v953_v61 = vadd.f32 %v2490_v30, %v841_v42  ;;  %v1396_v27 = vadd.f32 %v2549_v14, %v1284_v10  ;;  %vm795_vm13 = vcmp.eq.s32.totalorder %v3290_v49, %v4275_v8 }
 0x39f   : > { %v1521_v46 = vpack.c.bf16 %v1492_v19, %v3838_v16 }
 0x3a0   : > { %v1065_v53 = vadd.f32 %v2506_v13, %v953_v61  ;;  %v1493_v43 = vmul.f32 %v4133_v45, %v1396_v27  ;;  %v1286_v58 = vadd.f32 %v2535_v34, %v1174_v17  ;;  %v4781_v17 = vld [vmem:[#allocation81_spill] sm:$0xff]  ;;  %v2478_v34 = vsel %vm797_vm11, 1.0, %v3049_v15 }
 0x3a1   : > { %1800 = vmatmul.mubr.bf16.vlgmr.msra.gmra.mxu1 %v1521_v46  ;;  %v1214_v31 = vpop.permute.xlu1 %1213  ;;  %vm589_vm10 = vcmp.eq.s32.totalorder %v3290_v49, %v4781_v17 }
 0x3a2   : > { %1807 = vmatprep.mubr.bf16.mxu1 %v4775_v1  ;;  %v1522_v16 = vpack.c.bf16 %v3869_v24, %v1493_v43  ;;  %v1398_v23 = vadd.f32 %v2551_v48, %v1286_v58  ;;  %2641 = vmatpush3.bf16.msra.mxu1 %v2906_v20  ;;  %v2910_v24 = vld [vmem:[%s4611_s3 + $0x28] sm:$0xff]   ;;  %vm1240_vm6 = vcmp.eq.s32.totalorder %v3290_v49, %v1214_v31  ;;  %v2446_v27 = vsel %vm589_vm10, 1.0, %v3049_v15  ;;  %v2915_v58 = vld [vmem:[%s4611_s3 + $0x50] sm:$0xff]  }
 0x3a3   : > { %2642 = vmatprep.subr.bf16.mxu1 %v2907_v59  ;;  %v1177_v32 = vadd.f32 %v2522_v51, %v1065_v53  ;;  %v1335_v59 = vpop.permute.xlu0 %1334  ;;  %v4782_v48 = vld [vmem:[#allocation59_spill] sm:$0xff] }
 0x3a4   : > { %v1495_v45 = vmul.f32 %v4189_v40, %v1398_v23  ;;  %v1466_v40 = vmax.f32 %v4778_v35, 1.0  ;;  %v1467_v31 = vmax.f32 %v4782_v48, 1.0  ;;  %vm1355_vm4 = vcmp.eq.s32.totalorder %v3290_v49, %v1335_v59 }
 0x3a5   : > { %v1217_v25 = vpop.permute.xlu1 %1216 }
 0x3a6   : > { %v1523_v62 = vpack.c.bf16 %v3882_v3, %v1495_v45  ;;  %2643 = vmatpush3.bf16.msra.mxu1 %v2908_v28  ;;  %v2912_v3 = vld [vmem:[%s4611_s3 + $0x20] sm:$0xff]   ;;  %2949 = vrcp.f32 %v1466_v40  ;;  %vm1241_vm7 = vcmp.eq.s32.totalorder %v3290_v49, %v1217_v25  ;;  %v2917_v28 = vld [vmem:[%s4611_s3 + $0x48] sm:$0xff]  }
 0x3a7   : > { %2644 = vmatprep.subr.bf16.mxu1 %v2909_v21  ;;  %2951 = vrcp.f32 %v1465_v6  ;;  %v2538_v33 = vsel %vm1241_vm7, 1.0, %v3049_v15  ;;  %v4783_v45 = vld [vmem:[#allocation82_spill] sm:$0xff]  ;;  %v2919_v40 = vld [vmem:[%s4611_s3 + $0x40] sm:$0xff]  }
 0x3a8   : > { %v1289_v50 = vadd.f32 %v2538_v33, %v1177_v32  ;;  %v1468_v8 = vmax.f32 %v4783_v45, 1.0  ;;  %v2918_v21 = vld [vmem:[%s4611_s3 + $0x8] sm:$0xff]   ;;  %2953 = vrcp.f32 %v1467_v31 }
 0x3a9   : > { %1808 = vmatmul.mubr.bf16.gmra.mxu1 %v1522_v16  ;;  %v2476_v16 = vsel %vm795_vm13, 1.0, %v3049_v15 }
 0x3aa   : > { %v884_v57 = vpop.permute.xlu1 %883  ;;  %1815 = vmatprep.mubr.bf16.mxu1 %v4775_v1  ;;  %2645 = vmatpush3.bf16.msra.mxu1 %v2910_v24  ;;  %v1108_v24 = vpop.permute.xlu0 %1107  ;;  %2955 = vrcp.f32 %v1468_v8 }
 0x3ab   : > { %vm906_vm5 = vcmp.eq.s32.totalorder %v3290_v49, %v884_v57  ;;  %2646 = vmatprep.subr.bf16.mxu1 %v2911_v54  ;;  %vm1130_vm3 = vcmp.eq.s32.totalorder %v3290_v49, %v1108_v24 }
 0x3ac   : > { %v2491_v52 = vsel %vm906_vm5, 1.0, %v3049_v15 }
 0x3ad   : > { %v954_v44 = vadd.f32 %v2491_v52, %v3925_v37  ;;  %v2537_v37 = vsel %vm1240_vm6, 1.0, %v3049_v15 }
 0x3ae   : > { %v887_v12 = vpop.permute.xlu1 %886  ;;  %2647 = vmatpush3.bf16.msra.mxu1 %v2912_v3  ;;  %v1288_v56 = vadd.f32 %v2537_v37, %v3930_v60 }
 0x3af   : > { %v4325_v29 = vadd.f32 %v2507_v5, %v954_v44  ;;  %2648 = vmatprep.subr.bf16.mxu1 %v2913_v39  ;;  %vm907_vm14 = vcmp.eq.s32.totalorder %v3290_v49, %v887_v12  ;;  %v2523_v39 = vsel %vm1130_vm3, 1.0, %v3049_v15  ;;  %v2556_v5 = vsel %vm1355_vm4, 1.0, %v3049_v15 }
 0x3b0   : > { %v2492_v25 = vsel %vm907_vm14, 1.0, %v3049_v15 }
 0x3b1   : > { %1816 = vmatmul.mubr.bf16.gmra.mxu1 %v1523_v62  ;;  %v843_v62 = vadd.f32 %v2476_v16, %v3914_v36  ;;  %v2920_v36 = vld [vmem:[%s4611_s3] sm:$0xff]  }
 0x3b2   : > { %1823 = vmatprep.mubr.bf16.mxu1 %v4775_v1  ;;  %2649 = vmatpush3.bf16.msra.mxu1 %v2914_v0  ;;  %v1178_v0 = vadd.f32 %v2523_v39, %v4325_v29 }
 0x3b3   : > { %v1326_v55 = vpop.permute.xlu1 %1325  ;;  %v2950_v9 = vpop.eup %2949  ;;  %2650 = vmatprep.subr.bf16.mxu1 %v2915_v58  ;;  %v955_v7 = vadd.f32 %v2492_v25, %v843_v62 }
 0x3b4   : > { %vm1352_vm8 = vcmp.eq.s32.totalorder %v3290_v49, %v1326_v55  ;;  %v2952_v42 = vpop.eup %2951 }
 0x3b5   : > { %v2553_v2 = vsel %vm1352_vm8, 1.0, %v3049_v15 }
 0x3b6   : > { %v1400_v4 = vadd.f32 %v2553_v2, %v1288_v56  ;;  %2651 = vmatpush3.bf16.msra.mxu1 %v2916_v18  ;;  %v2954_v2 = vpop.eup %2953 }
 0x3b7   : > { %v1329_v47 = vpop.permute.xlu1 %1328  ;;  %2652 = vmatprep.subr.bf16.mxu1 %v2917_v28  ;;  %v2956_v32 = vpop.eup %2955 }
 0x3b8   : > { %vm1353_vm9 = vcmp.eq.s32.totalorder %v3290_v49, %v1329_v47  ;;  %v1497_v10 = vmul.f32 %v2952_v42, %v1400_v4 }
 0x3b9   : > { %v2554_v22 = vsel %vm1353_vm9, 1.0, %v3049_v15  ;;  %vm908_vm9 = vcmp.eq.s32.totalorder %v3290_v49, %v3846_v26 }
 0x3ba   : > { %v1401_v63 = vadd.f32 %v2554_v22, %v1289_v50  ;;  %2653 = vmatpush3.bf16.msra.mxu1 %v2918_v21 }
 0x3bb   : > { %2654 = vmatprep.subr.bf16.mxu1 %v2919_v40 }
 0x3bc   : > { %v1498_v14 = vmul.f32 %v2950_v9, %v1401_v63  ;;  %v999_v41 = vpop.permute.xlu1 %998 }
 0x3bd   : > { %vm1019_vm15 = vcmp.eq.s32.totalorder %v3290_v49, %v999_v41 }
 0x3be   : > { %v1524_v30 = vpack.c.bf16 %v1498_v14, %v1497_v10  ;;  %v2508_v54 = vsel %vm1019_vm15, 1.0, %v3049_v15  ;;  %2655 = vmatpush3.bf16.msra.mxu1 %v2920_v36  ;;  %v4784_v10 = vld [vmem:[#allocation69_spill] sm:$0xff] }
 0x3bf   : > { %v1067_v57 = vadd.f32 %v2508_v54, %v955_v7  ;;  %v1469_v14 = vmax.f32 %v4784_v10, 1.0  ;;  %v4789_v10 = vld [vmem:[#allocation9_spill] sm:$0xff] }
 0x3c0   : > { %1824 = vmatmul.mubr.bf16.gmra.mxu1 %v1524_v30 }
 0x3c1   : > { %v4343_v19 = vpop.permute.xlu1 %569  ;;  %1831 = vmatprep.mubr.bf16.mxu1 %v4775_v1  ;;  %2957 = vrcp.f32 %v1469_v14 }
 0x3c2   : > { %vm588_vm7 = vcmp.eq.s32.totalorder %v3290_v49, %v4343_v19  ;;  %v2493_v19 = vsel %vm908_vm9, 1.0, %v3049_v15 }
 0x3c3   : > { %v2445_v63 = vsel %vm588_vm7, 1.0, %v3049_v15 }
 0x3c6   : > { %v4346_v60 = vpop.permute.xlu1 %665 }
 0x3c7   : > { %vm684_vm0 = vcmp.eq.s32.totalorder %v3290_v49, %v4346_v60  ;;  %v1114_v60 = vpop.permute.xlu0 %1113 }
 0x3c8   : > { %v2461_v22 = vsel %vm684_vm0, 1.0, %v3049_v15 }
 0x3c9   : > { %v732_v41 = vadd.f32 %v2461_v22, %v2445_v63 }
 0x3ca   : > { %v669_v61 = vpop.permute.xlu1 %668 }
 0x3cb   : > { %vm685_vm12 = vcmp.eq.s32.totalorder %v3290_v49, %v669_v61  ;;  %v1470_v61 = vmax.f32 %v4023_v11, 1.0 }
 0x3cc   : > { %v2462_v13 = vsel %vm685_vm12, 1.0, %v3049_v15  ;;  %vm1132_vm12 = vcmp.eq.s32.totalorder %v3290_v49, %v1114_v60 }
 0x3cd   : > { %v733_v46 = vadd.f32 %v2462_v13, %v2446_v27  ;;  %2959 = vrcp.f32 %v1470_v61 }
 0x3ce   : > { %v2958_v21 = vpop.eup %2957 }
 0x3cf   : > { %v1111_v20 = vpop.permute.xlu1 %1110  ;;  %v4356_v53 = vadd.f32 %v2478_v34, %v733_v46  ;;  %v2525_v46 = vsel %vm1132_vm12, 1.0, %v3049_v15 }
 0x3d0   : > { %vm1131_vm1 = vcmp.eq.s32.totalorder %v3290_v49, %v1111_v20  ;;  %v1229_v20 = vpop.permute.xlu0 %1228 }
 0x3d1   : > { %v2524_v6 = vsel %vm1131_vm1, 1.0, %v3049_v15  ;;  %vm1245_vm1 = vcmp.eq.s32.totalorder %v3290_v49, %v1229_v20  ;;  %v4793_v20 = vld [vmem:[#allocation34_spill] sm:$0xff] }
 0x3d2   : > { %v1179_v3 = vadd.f32 %v2524_v6, %v1067_v57  ;;  %v2542_v28 = vsel %vm1245_vm1, 1.0, %v3049_v15  ;;  %v4438_v6 = vld [vmem:[%s4612_s4] ss:$0 sm:$0xff] }
 0x3d4   : > { %v4358_v43 = vpop.permute.xlu1 %777 }
 0x3d5   : > { %vm796_vm8 = vcmp.eq.s32.totalorder %v3290_v49, %v4358_v43 }
 0x3d6   : > { %v2477_v42 = vsel %vm796_vm8, 1.0, %v3049_v15 }
 0x3d7   : > { %v844_v30 = vadd.f32 %v2477_v42, %v732_v41  ;;  %v2923_v42 = vld [vmem:[%s4611_s3 + $0xa8] sm:$0xff]   ;;  %v4790_v41 = vld [vmem:[#allocation32_spill] sm:$0xff] }
 0x3d9   : > { %v1220_v23 = vpop.permute.xlu1 %1219  ;;  %v956_v27 = vadd.f32 %v2493_v19, %v844_v30  ;;  %v4791_v19 = vld [vmem:[#allocation10_spill] sm:$0xff] }
 0x3da   : > { %vm1242_vm5 = vcmp.eq.s32.totalorder %v3290_v49, %v1220_v23 }
 0x3db   : > { %v2539_v12 = vsel %vm1242_vm5, 1.0, %v3049_v15 }
 0x3dc   : > { %v1290_v55 = vadd.f32 %v2539_v12, %v1178_v0  ;;  %v4786_v12 = vld [vmem:[#allocation29_spill] sm:$0xff] }
 0x3dd   : > { %v1223_v35 = vpop.permute.xlu1 %1222 }
 0x3de   : > { %vm1243_vm2 = vcmp.eq.s32.totalorder %v3290_v49, %v1223_v35  ;;  %v2960_v35 = vpop.eup %2959 }
 0x3df   : > { %v2540_v38 = vsel %vm1243_vm2, 1.0, %v3049_v15 }
 0x3e0   : > { %v1291_v44 = vadd.f32 %v2540_v38, %v1179_v3 }
 0x3e2   : > { %v893_v52 = vpop.permute.xlu1 %892  ;;  %v1403_v51 = vadd.f32 %v2556_v5, %v1291_v44  ;;  %v4785_v44 = vld [vmem:[#allocation5_spill] sm:$0xff] }
 0x3e3   : > { %vm909_vm11 = vcmp.eq.s32.totalorder %v3290_v49, %v893_v52 }
 0x3e4   : > { %v1500_v4 = vmul.f32 %v2956_v32, %v1403_v51  ;;  %v2494_v26 = vsel %vm909_vm11, 1.0, %v3049_v15  ;;  %v4788_v51 = vld [vmem:[#allocation30_spill] sm:$0xff] }
 0x3e5   : > { %v957_v43 = vadd.f32 %v2494_v26, %v4356_v53 }
 0x3e7   : > { %v1332_v37 = vpop.permute.xlu1 %1331 }
 0x3e8   : > { %vm1354_vm6 = vcmp.eq.s32.totalorder %v3290_v49, %v1332_v37  ;;  %v4787_v37 = vld [vmem:[#allocation7_spill] sm:$0xff] }
 0x3e9   : > { %v2555_v33 = vsel %vm1354_vm6, 1.0, %v3049_v15 }
 0x3ea   : > { %v1402_v56 = vadd.f32 %v2555_v33, %v1290_v55 }
 0x3ec   : > { %v1499_v47 = vmul.f32 %v2954_v2, %v1402_v56  ;;  %v1002_v50 = vpop.permute.xlu1 %1001 }
 0x3ed   : > { %vm1020_vm10 = vcmp.eq.s32.totalorder %v3290_v49, %v1002_v50  ;;  %v2922_v50 = vld [vmem:[%s4611_s3 + $0xb0] sm:$0xff]  }
 0x3ee   : > { %v1525_v29 = vpack.c.bf16 %v1500_v4, %v1499_v47 }
 0x3f0   : > { %v1005_v9 = vpop.permute.xlu1 %1004  ;;  %1832 = vmatmul.mubr.bf16.gmra.mxu1 %v1525_v29 }
 0x3f1   : > { %1839 = vmatprep.mubr.bf16.mxu1 %v4775_v1  ;;  %v2509_v1 = vsel %vm1020_vm10, 1.0, %v3049_v15  ;;  %vm1021_vm13 = vcmp.eq.s32.totalorder %v3290_v49, %v1005_v9 }
 0x3f2   : > { %v1068_v34 = vadd.f32 %v2509_v1, %v956_v27  ;;  %v2510_v11 = vsel %vm1021_vm13, 1.0, %v3049_v15 }
 0x3f3   : > { %v1069_v48 = vadd.f32 %v2510_v11, %v957_v43 }
 0x3f4   : > { %v1180_v59 = vadd.f32 %v2525_v46, %v1068_v34 }
 0x3f5   : > { %v1117_v17 = vpop.permute.xlu1 %1116 }
 0x3f6   : > { %vm1133_vm14 = vcmp.eq.s32.totalorder %v3290_v49, %v1117_v17  ;;  %v4792_v17 = vld [vmem:[#allocation33_spill] sm:$0xff] }
 0x3f7   : > { %v2526_v58 = vsel %vm1133_vm14, 1.0, %v3049_v15 }
 0x3f8   : > { %v1181_v16 = vadd.f32 %v2526_v58, %v1069_v48  ;;  %v4794_v58 = vld [vmem:[#allocation35_spill] sm:$0xff]  ;;  %v4795_v48 = vld [vmem:[#allocation12_spill] sm:$0xff] }
 0x3fa   : > { %v1226_v13 = vpop.permute.xlu1 %1225  ;;  %v1293_v25 = vadd.f32 %v2542_v28, %v1181_v16  ;;  %v4796_v28 = vld [vmem:[#allocation11_spill] sm:$0xff] }
 0x3fb   : > { %vm1244_vm15 = vcmp.eq.s32.totalorder %v3290_v49, %v1226_v13 }
 0x3fc   : > { %v2541_v18 = vsel %vm1244_vm15, 1.0, %v3049_v15 }
 0x3fd   : > { %v1292_v23 = vadd.f32 %v2541_v18, %v1180_v59 }
 0x3ff   : > { %v1338_v31 = vpop.permute.xlu1 %1337 }
 0x400   : > { %vm1356_vm2 = vcmp.eq.s32.totalorder %v3290_v49, %v1338_v31 }
 0x401   : > { %v2557_v45 = vsel %vm1356_vm2, 1.0, %v3049_v15 }
 0x402   : > { %v1404_v8 = vadd.f32 %v2557_v45, %v1292_v23 }
 0x403   : > { %v1341_v53 = vpop.permute.xlu1 %1340 }
 0x404   : > { %v1501_v62 = vmul.f32 %v2958_v21, %v1404_v8  ;;  %vm1357_vm3 = vcmp.eq.s32.totalorder %v3290_v49, %v1341_v53  ;;  %v2921_v49 = vld [vmem:[%s4611_s3 + $0xb8] sm:$0xff]  }
 0x405   : > { %v2558_v24 = vsel %vm1357_vm3, 1.0, %v3049_v15  ;;  %2720 = vmatprep.subr.bf16.mxu1 %v2921_v49 }
 0x406   : > { %v1405_v54 = vadd.f32 %v2558_v24, %v1293_v25  ;;  %v4797_v24 = vld [vmem:[#allocation36_spill] sm:$0xff] }
 0x408   : > { %v1502_v40 = vmul.f32 %v2960_v35, %v1405_v54  ;;  %v4798_v35 = vld [vmem:[#allocation38_spill] sm:$0xff] }
 0x40a   : > { %v1526_v7 = vpack.c.bf16 %v1502_v40, %v1501_v62 }
 0x40c   : > { %1840 = vmatmul.mubr.bf16.gmra.mxu1 %v1526_v7 }
 0x454   : > { %v1785_v36 = vpop.f32.mrf.mxu0 }
 0x455   : > { %v4799_v36 = vld [vmem:[#allocation14_spill] sm:$0xff] }
 0x456   : > { %v1786_v57 = vpop.f32.mrf.mxu0 }
 0x457   : > { %v1852_v3 = vadd.f32 %v4438_v6, %v1786_v57 }
 0x458   : > { %v1788_v38 = vpop.f32.mrf.mxu0 }
 0x459   : > { %v1868_v5 = vadd.f32 %v1852_v3, %v4785_v44  ;;  %v1884_v0 = vadd.f32 %v1852_v3, %v4786_v12  ;;  %v4801_v12 = vld [vmem:[#allocation39_spill] sm:$0xff] }
 0x45a   : > { %v1789_v52 = vpop.f32.mrf.mxu0 }
 0x45b   : > { %v1853_v15 = vadd.f32 %v4438_v6, %v1789_v52  ;;  %v4800_v52 = vld [vmem:[#allocation13_spill] sm:$0xff] }
 0x45c   : > { %v1793_v39 = vpop.f32.mrf.mxu0 }
 0x45d   : > { %v1869_v55 = vadd.f32 %v1853_v15, %v4787_v37  ;;  %v1885_v33 = vadd.f32 %v1853_v15, %v4788_v51  ;;  %v4802_v37 = vld [vmem:[#allocation41_spill] sm:$0xff]  ;;  %v4803_v51 = vld [vmem:[#allocation16_spill] sm:$0xff] }
 0x45e   : > { %v1794_v2 = vpop.f32.mrf.mxu0 }
 0x45f   : > { %v1900_v56 = vpack.c.bf16 %v1869_v55, %v1868_v5  ;;  %v1901_v32 = vpack.c.bf16 %v1885_v33, %v1884_v0  ;;  %v1854_v4 = vadd.f32 %v4438_v6, %v1794_v2 }
 0x460   : > { %v1796_v47 = vpop.f32.mrf.mxu0 }
 0x461   : > { %v1801_v29 = vpop.f32.mrf.mxu1  ;;  %2048 = vmatprep.mubr.bf16.mxu1 %v1901_v32  ;;  %v1870_v14 = vadd.f32 %v1854_v4, %v4789_v10  ;;  %v1886_v30 = vadd.f32 %v1854_v4, %v4790_v41 }
 0x462   : > { %v1797_v22 = vpop.f32.mrf.mxu0  ;;  %2049 = vmatmul.mubr.bf16.vlgmr.msra.gmra.mxu1 %v1900_v56  ;;  %v4804_v56 = vld [vmem:[#allocation15_spill] sm:$0xff] }
 0x463   : > { %v1855_v9 = vadd.f32 %v4438_v6, %v1797_v22  ;;  %v1802_v63 = vpop.f32.mrf.mxu1  ;;  %2721 = vmatpush3.bf16.msra.mxu1 %v2921_v49 }
 0x464   : > { %2722 = vmatprep.subr.bf16.mxu1 %v2922_v50  ;;  %v1856_v27 = vadd.f32 %v4438_v6, %v1802_v63 }
 0x465   : > { %v1871_v60 = vadd.f32 %v1855_v9, %v4791_v19  ;;  %v1887_v61 = vadd.f32 %v1855_v9, %v4792_v17  ;;  %v1804_v1 = vpop.f32.mrf.mxu1 }
 0x466   : > { %v1888_v43 = vadd.f32 %v1856_v27, %v4793_v20  ;;  %v1872_v45 = vadd.f32 %v1856_v27, %v4796_v28  ;;  %v2924_v27 = vld [vmem:[%s4611_s3 + $0xa0] sm:$0xff]   ;;  %v4811_v28 = vld [vmem:[#allocation20_spill] sm:$0xff] }
 0x467   : > { %v1805_v26 = vpop.f32.mrf.mxu1  ;;  %v1903_v34 = vpack.c.bf16 %v1887_v61, %v1886_v30  ;;  %v1902_v13 = vpack.c.bf16 %v1871_v60, %v1870_v14  ;;  %2723 = vmatpush3.bf16.msra.mxu1 %v2922_v50  ;;  %v4806_v14 = vld [vmem:[#allocation43_spill] sm:$0xff]  ;;  %v4807_v30 = vld [vmem:[#allocation18_spill] sm:$0xff]  ;;  %v4808_v60 = vld [vmem:[#allocation44_spill] sm:$0xff] }
 0x468   : > { %v1857_v46 = vadd.f32 %v4438_v6, %v1805_v26  ;;  %2724 = vmatprep.subr.bf16.mxu1 %v2923_v42  ;;  %v2925_v26 = vld [vmem:[%s4611_s3 + $0x98] sm:$0xff]  }
 0x469   : > { %v1809_v11 = vpop.f32.mrf.mxu1  ;;  %2056 = vmatprep.mubr.bf16.mxu1 %v1903_v34  ;;  %v2926_v34 = vld [vmem:[%s4611_s3 + $0x90] sm:$0xff]  }
 0x46a   : > { %v1889_v18 = vadd.f32 %v1857_v46, %v4794_v58  ;;  %2057 = vmatmul.mubr.bf16.gmra.mxu1 %v1902_v13  ;;  %v1873_v31 = vadd.f32 %v1857_v46, %v4795_v48  ;;  %v2927_v46 = vld [vmem:[%s4611_s3 + $0x88] sm:$0xff]   ;;  %v4809_v48 = vld [vmem:[#allocation19_spill] sm:$0xff] }
 0x46b   : > { %v1810_v59 = vpop.f32.mrf.mxu1  ;;  %2725 = vmatpush3.bf16.msra.mxu1 %v2923_v42  ;;  %v4805_v42 = vld [vmem:[#allocation17_spill] sm:$0xff] }
 0x46c   : > { %v1905_v16 = vpack.c.bf16 %v1889_v18, %v1888_v43  ;;  %v1858_v8 = vadd.f32 %v4438_v6, %v1810_v59  ;;  %v1904_v25 = vpack.c.bf16 %v1873_v31, %v1872_v45  ;;  %2726 = vmatprep.subr.bf16.mxu1 %v2924_v27  ;;  %v2928_v43 = vld [vmem:[%s4611_s3 + $0x80] sm:$0xff]  }
 0x46d   : > { %v1812_v23 = vpop.f32.mrf.mxu1 }
 0x46e   : > { %2064 = vmatprep.mubr.bf16.mxu1 %v1905_v16  ;;  %v1890_v54 = vadd.f32 %v1858_v8, %v4797_v24  ;;  %v1874_v49 = vadd.f32 %v1858_v8, %v4800_v52  ;;  %v4810_v16 = vld [vmem:[#allocation46_spill] sm:$0xff]  ;;  %v4812_v8 = vld [vmem:[#allocation48_spill] sm:$0xff] }
 0x46f   : > { %v1813_v21 = vpop.f32.mrf.mxu1  ;;  %2727 = vmatpush3.bf16.msra.mxu1 %v2924_v27  ;;  %v4815_v52 = vld [vmem:[#allocation22_spill] sm:$0xff] }
 0x470   : > { %v1859_v53 = vadd.f32 %v4438_v6, %v1813_v21  ;;  %2728 = vmatprep.subr.bf16.mxu1 %v2925_v26 }
 0x471   : > { %v1817_v62 = vpop.f32.mrf.mxu1 }
 0x472   : > { %v1891_v40 = vadd.f32 %v1859_v53, %v4798_v35  ;;  %2065 = vmatmul.mubr.bf16.gmra.mxu1 %v1904_v25  ;;  %v1875_v57 = vadd.f32 %v1859_v53, %v4799_v36  ;;  %v4813_v36 = vld [vmem:[#allocation21_spill] sm:$0xff] }
 0x473   : > { %v1818_v7 = vpop.f32.mrf.mxu1  ;;  %2729 = vmatpush3.bf16.msra.mxu1 %v2925_v26 }
 0x474   : > { %v1907_v38 = vpack.c.bf16 %v1891_v40, %v1890_v54  ;;  %v1860_v15 = vadd.f32 %v4438_v6, %v1818_v7  ;;  %v1906_v5 = vpack.c.bf16 %v1875_v57, %v1874_v49  ;;  %2730 = vmatprep.subr.bf16.mxu1 %v2926_v34 }
 0x475   : > { %v1820_v3 = vpop.f32.mrf.mxu1 }
 0x476   : > { %2072 = vmatprep.mubr.bf16.mxu1 %v1907_v38  ;;  %v1892_v0 = vadd.f32 %v1860_v15, %v4801_v12  ;;  %v1876_v32 = vadd.f32 %v1860_v15, %v4804_v56  ;;  %v4814_v38 = vld [vmem:[#allocation49_spill] sm:$0xff]  ;;  %v4816_v15 = vld [vmem:[#allocation50_spill] sm:$0xff] }
 0x477   : > { %v1821_v39 = vpop.f32.mrf.mxu1  ;;  %2731 = vmatpush3.bf16.msra.mxu1 %v2926_v34 }
 0x478   : > { %v1861_v44 = vadd.f32 %v4438_v6, %v1821_v39  ;;  %2732 = vmatprep.subr.bf16.mxu1 %v2927_v46 }
 0x47a   : > { %v1893_v55 = vadd.f32 %v1861_v44, %v4802_v37  ;;  %2073 = vmatmul.mubr.bf16.gmra.mxu1 %v1906_v5  ;;  %v1877_v33 = vadd.f32 %v1861_v44, %v4803_v51 }
 0x47b   : > { %2733 = vmatpush3.bf16.msra.mxu1 %v2927_v46 }
 0x47c   : > { %v1909_v2 = vpack.c.bf16 %v1893_v55, %v1892_v0  ;;  %v1908_v50 = vpack.c.bf16 %v1877_v33, %v1876_v32  ;;  %2734 = vmatprep.subr.bf16.mxu1 %v2928_v43  ;;  %v4515_v55 = vld [vmem:[%s4612_s4 + $0x1] ss:$0 sm:$0xff] }
 0x47e   : > { %2080 = vmatprep.mubr.bf16.mxu1 %v1909_v2 }
 0x47f   : > { %2735 = vmatpush3.bf16.msra.mxu1 %v2928_v43 }
 0x480   : > { %v1825_v47 = vpop.f32.mrf.mxu1 }
 0x482   : > { %v1826_v4 = vpop.f32.mrf.mxu1  ;;  %2081 = vmatmul.mubr.bf16.gmra.mxu1 %v1908_v50 }
 0x483   : > { %v1862_v22 = vadd.f32 %v4438_v6, %v1826_v4 }
 0x484   : > { %v1828_v29 = vpop.f32.mrf.mxu1 }
 0x485   : > { %v1878_v10 = vadd.f32 %v1862_v22, %v4805_v42  ;;  %v1894_v41 = vadd.f32 %v1862_v22, %v4806_v14 }
 0x486   : > { %v1829_v9 = vpop.f32.mrf.mxu1 }
 0x487   : > { %v1863_v63 = vadd.f32 %v4438_v6, %v1829_v9 }
 0x489   : > { %v1879_v19 = vadd.f32 %v1863_v63, %v4807_v30  ;;  %v1895_v17 = vadd.f32 %v1863_v63, %v4808_v60 }
 0x48b   : > { %v1911_v61 = vpack.c.bf16 %v1895_v17, %v1894_v41  ;;  %v1910_v1 = vpack.c.bf16 %v1879_v19, %v1878_v10 }
 0x48d   : > { %2088 = vmatprep.mubr.bf16.mxu1 %v1911_v61 }
 0x48e   : > { %2089 = vmatmul.mubr.bf16.gmra.mxu1 %v1910_v1 }
 0x4b0   : > { %v1833_v13 = vpop.f32.mrf.mxu1 }
 0x4b2   : > { %v1834_v11 = vpop.f32.mrf.mxu1 }
 0x4b3   : > { %v1864_v58 = vadd.f32 %v4438_v6, %v1834_v11 }
 0x4b4   : > { %v1836_v20 = vpop.f32.mrf.mxu1 }
 0x4b5   : > { %v1880_v31 = vadd.f32 %v1864_v58, %v4809_v48  ;;  %v1896_v23 = vadd.f32 %v1864_v58, %v4810_v16 }
 0x4b6   : > { %v1837_v18 = vpop.f32.mrf.mxu1 }
 0x4b7   : > { %v1865_v59 = vadd.f32 %v4438_v6, %v1837_v18 }
 0x4b9   : > { %v1881_v45 = vadd.f32 %v1865_v59, %v4811_v28  ;;  %v1897_v21 = vadd.f32 %v1865_v59, %v4812_v8 }
 0x4bb   : > { %v1913_v53 = vpack.c.bf16 %v1897_v21, %v1896_v23  ;;  %v1912_v25 = vpack.c.bf16 %v1881_v45, %v1880_v31 }
 0x4bd   : > { %2096 = vmatprep.mubr.bf16.mxu1 %v1913_v53 }
 0x4be   : > { %2097 = vmatmul.mubr.bf16.gmra.mxu1 %v1912_v25 }
 0x4cc   : > { %v1841_v62 = vpop.f32.mrf.mxu1 }
 0x4ce   : > { %v1842_v24 = vpop.f32.mrf.mxu1 }
 0x4cf   : > { %v1866_v35 = vadd.f32 %v4438_v6, %v1842_v24 }
 0x4d0   : > { %v1844_v54 = vpop.f32.mrf.mxu1 }
 0x4d1   : > { %v1882_v57 = vadd.f32 %v1866_v35, %v4813_v36  ;;  %v1898_v3 = vadd.f32 %v1866_v35, %v4814_v38 }
 0x4d2   : > { %v1845_v40 = vpop.f32.mrf.mxu1 }
 0x4d3   : > { %v1867_v7 = vadd.f32 %v4438_v6, %v1845_v40 }
 0x4d5   : > { %v1883_v49 = vadd.f32 %v1867_v7, %v4815_v52  ;;  %v1899_v39 = vadd.f32 %v1867_v7, %v4816_v15 }
 0x4d7   : > { %v1915_v44 = vpack.c.bf16 %v1899_v39, %v1898_v3  ;;  %v1914_v5 = vpack.c.bf16 %v1883_v49, %v1882_v57 }
 0x4d9   : > { %2104 = vmatprep.mubr.bf16.mxu1 %v1915_v44 }
 0x4da   : > { %2105 = vmatmul.mubr.bf16.gmra.mxu1 %v1914_v5 }
 0x522   : > { %v2656_v12 = vpop.f32.mrf.mxu1 }
 0x524   : > { %v2657_v0 = vpop.f32.mrf.mxu1 }
 0x525   : > { %v2658_v37 = vadd.f32 %v2657_v0, %v2656_v12 }
 0x526   : > { %v2659_v6 = vpop.f32.mrf.mxu1 }
 0x527   : > { %v2051_v33 = vadd.f32 %v2658_v37, %v4515_v55 }
 0x528   : > { %v2660_v51 = vpop.f32.mrf.mxu1 }
 0x529   : > { %v2661_v2 = vadd.f32 %v2660_v51, %v2659_v6  ;;  %v2113_v50 = vmax.f32 %v2051_v33, 0.0 }
 0x52a   : > { %v2662_v56 = vpop.f32.mrf.mxu1 }
 0x52b   : > { %v2054_v32 = vadd.f32 %v2661_v2, %v4515_v55 }
 0x52c   : > { %v2663_v47 = vpop.f32.mrf.mxu1 }
 0x52d   : > { %v2114_v4 = vmax.f32 %v2054_v32, 0.0  ;;  %v2664_v29 = vadd.f32 %v2663_v47, %v2662_v56 }
 0x52e   : > { %v2665_v22 = vpop.f32.mrf.mxu1 }
 0x52f   : > { %v2129_v9 = vpack.c.bf16 %v2114_v4, %v2113_v50  ;;  %v2059_v42 = vadd.f32 %v2664_v29, %v4515_v55 }
 0x530   : > { %v2666_v63 = vpop.f32.mrf.mxu1 }
 0x531   : > { %v2667_v10 = vadd.f32 %v2666_v63, %v2665_v22  ;;  %2736 = vmatprep.mubr.bf16.mxu1 %v2129_v9  ;;  %v2115_v19 = vmax.f32 %v2059_v42, 0.0 }
 0x532   : > { %v2668_v14 = vpop.f32.mrf.mxu1 }
 0x533   : > { %v2062_v41 = vadd.f32 %v2667_v10, %v4515_v55 }
 0x534   : > { %v2669_v30 = vpop.f32.mrf.mxu1 }
 0x535   : > { %v2116_v60 = vmax.f32 %v2062_v41, 0.0  ;;  %v2670_v17 = vadd.f32 %v2669_v30, %v2668_v14 }
 0x536   : > { %v2671_v61 = vpop.f32.mrf.mxu1 }
 0x537   : > { %v2130_v1 = vpack.c.bf16 %v2116_v60, %v2115_v19  ;;  %v2067_v26 = vadd.f32 %v2670_v17, %v4515_v55 }
 0x538   : > { %v2672_v27 = vpop.f32.mrf.mxu1 }
 0x539   : > { %v2673_v34 = vadd.f32 %v2672_v27, %v2671_v61  ;;  %2737 = vmatmul.mubr.bf16.vlgmr.msra.gmra.mxu1 %v2130_v1  ;;  %v2117_v20 = vmax.f32 %v2067_v26, 0.0  ;;  %v2625_v1 = vld [vmem:[%s4612_s4 + $0x2] ss:$0 sm:$0xff] }
 0x53a   : > { %v2674_v13 = vpop.f32.mrf.mxu1 }
 0x53b   : > { %v2070_v46 = vadd.f32 %v2673_v34, %v4515_v55 }
 0x53c   : > { %v2675_v11 = vpop.f32.mrf.mxu1 }
 0x53d   : > { %v2118_v43 = vmax.f32 %v2070_v46, 0.0  ;;  %v2676_v58 = vadd.f32 %v2675_v11, %v2674_v13 }
 0x53e   : > { %v2677_v18 = vpop.f32.mrf.mxu1 }
 0x53f   : > { %v2131_v59 = vpack.c.bf16 %v2118_v43, %v2117_v20  ;;  %v2075_v31 = vadd.f32 %v2676_v58, %v4515_v55 }
 0x540   : > { %v2678_v48 = vpop.f32.mrf.mxu1 }
 0x541   : > { %v2679_v16 = vadd.f32 %v2678_v48, %v2677_v18  ;;  %2740 = vmatprep.mubr.bf16.mxu1 %v2131_v59  ;;  %v2119_v8 = vmax.f32 %v2075_v31, 0.0 }
 0x542   : > { %v2680_v23 = vpop.f32.mrf.mxu1 }
 0x543   : > { %v2078_v28 = vadd.f32 %v2679_v16, %v4515_v55 }
 0x544   : > { %v2681_v45 = vpop.f32.mrf.mxu1 }
 0x545   : > { %v2120_v21 = vmax.f32 %v2078_v28, 0.0  ;;  %v2682_v53 = vadd.f32 %v2681_v45, %v2680_v23 }
 0x546   : > { %v2683_v25 = vpop.f32.mrf.mxu1 }
 0x547   : > { %v2132_v62 = vpack.c.bf16 %v2120_v21, %v2119_v8  ;;  %v2083_v54 = vadd.f32 %v2682_v53, %v4515_v55 }
 0x548   : > { %v2684_v24 = vpop.f32.mrf.mxu1 }
 0x549   : > { %v2685_v35 = vadd.f32 %v2684_v24, %v2683_v25  ;;  %2741 = vmatmul.mubr.bf16.gmra.mxu1 %v2132_v62  ;;  %v2121_v7 = vmax.f32 %v2083_v54, 0.0 }
 0x54b   : > { %v2086_v40 = vadd.f32 %v2685_v35, %v4515_v55 }
 0x54d   : > { %v2122_v36 = vmax.f32 %v2086_v40, 0.0 }
 0x54e   : > { %v2686_v57 = vpop.f32.mrf.mxu1 }
 0x54f   : > { %v2133_v38 = vpack.c.bf16 %v2122_v36, %v2121_v7 }
 0x550   : > { %v2687_v3 = vpop.f32.mrf.mxu1 }
 0x551   : > { %v2688_v52 = vadd.f32 %v2687_v3, %v2686_v57  ;;  %2744 = vmatprep.mubr.bf16.mxu1 %v2133_v38 }
 0x552   : > { %v2689_v49 = vpop.f32.mrf.mxu1 }
 0x553   : > { %v2091_v39 = vadd.f32 %v2688_v52, %v4515_v55 }
 0x554   : > { %v2690_v15 = vpop.f32.mrf.mxu1 }
 0x555   : > { %v2691_v44 = vadd.f32 %v2690_v15, %v2689_v49  ;;  %v2123_v12 = vmax.f32 %v2091_v39, 0.0 }
 0x557   : > { %v2094_v5 = vadd.f32 %v2691_v44, %v4515_v55 }
 0x559   : > { %v2124_v0 = vmax.f32 %v2094_v5, 0.0 }
 0x55b   : > { %v2134_v37 = vpack.c.bf16 %v2124_v0, %v2123_v12 }
 0x55d   : > { %2745 = vmatmul.mubr.bf16.gmra.mxu1 %v2134_v37 }
 0x57e   : > { %v2692_v6 = vpop.f32.mrf.mxu1 }
 0x580   : > { %v2693_v51 = vpop.f32.mrf.mxu1 }
 0x581   : > { %v2694_v33 = vadd.f32 %v2693_v51, %v2692_v6 }
 0x582   : > { %v2695_v2 = vpop.f32.mrf.mxu1 }
 0x583   : > { %v2099_v32 = vadd.f32 %v2694_v33, %v4515_v55 }
 0x584   : > { %v2696_v56 = vpop.f32.mrf.mxu1 }
 0x585   : > { %v2697_v47 = vadd.f32 %v2696_v56, %v2695_v2  ;;  %v2125_v4 = vmax.f32 %v2099_v32, 0.0 }
 0x587   : > { %v2102_v50 = vadd.f32 %v2697_v47, %v4515_v55 }
 0x589   : > { %v2126_v29 = vmax.f32 %v2102_v50, 0.0 }
 0x58b   : > { %v2135_v22 = vpack.c.bf16 %v2126_v29, %v2125_v4 }
 0x58d   : > { %2748 = vmatprep.mubr.bf16.mxu1 %v2135_v22 }
 0x59a   : > { %v2698_v9 = vpop.f32.mrf.mxu1 }
 0x59c   : > { %v2699_v63 = vpop.f32.mrf.mxu1 }
 0x59d   : > { %v2700_v42 = vadd.f32 %v2699_v63, %v2698_v9 }
 0x59e   : > { %v2701_v10 = vpop.f32.mrf.mxu1 }
 0x59f   : > { %v2107_v41 = vadd.f32 %v2700_v42, %v4515_v55 }
 0x5a0   : > { %v2702_v14 = vpop.f32.mrf.mxu1 }
 0x5a1   : > { %v2703_v30 = vadd.f32 %v2702_v14, %v2701_v10  ;;  %v2127_v60 = vmax.f32 %v2107_v41, 0.0 }
 0x5a3   : > { %v2110_v19 = vadd.f32 %v2703_v30, %v4515_v55 }
 0x5a5   : > { %v2128_v17 = vmax.f32 %v2110_v19, 0.0 }
 0x5a7   : > { %v2136_v61 = vpack.c.bf16 %v2128_v17, %v2127_v60 }
 0x5a9   : > { %2749 = vmatmul.mubr.bf16.gmra.mxu1 %v2136_v61 }
 0x5f9   : > { %v2738_v27 = vpop.f32.mrf.mxu1 }
 0x5fa   : > { %v2232_v26 = vadd.f32 %v2738_v27, %v2625_v1 }
 0x5fb   : > { %v2223_v34 = vpop.f32.mrf.mxu1 }
 0x5fc   : > { %2288 = vst [vmem:[%s4539_s9 + $0x10] sm:$0xff] %v2232_v26  ;;  %v2224_v55 = vadd.f32 %v2625_v1, %v2223_v34 }
 0x5fd   : > { %v2739_v13 = vpop.f32.mrf.mxu1 }
 0x5fe   : > { %2286 = vst [vmem:[%s4539_s9] sm:$0xff] %v2224_v55  ;;  %v2235_v46 = vadd.f32 %v2739_v13, %v2625_v1 }
 0x5ff   : > { %v2226_v11 = vpop.f32.mrf.mxu1 }
 0x600   : > { %2289 = vst [vmem:[%s4539_s9 + $0x18] sm:$0xff] %v2235_v46  ;;  %v2227_v20 = vadd.f32 %v2625_v1, %v2226_v11 }
 0x602   : > { %2287 = vst [vmem:[%s4539_s9 + $0x8] sm:$0xff] %v2227_v20 }
 0x609   : > { %v2742_v43 = vpop.f32.mrf.mxu1 }
 0x60a   : > { %v2248_v58 = vadd.f32 %v2742_v43, %v2625_v1 }
 0x60b   : > { %v2239_v18 = vpop.f32.mrf.mxu1 }
 0x60c   : > { %2292 = vst [vmem:[%s4539_s9 + $0x30] sm:$0xff] %v2248_v58  ;;  %v2240_v59 = vadd.f32 %v2625_v1, %v2239_v18 }
 0x60d   : > { %v2743_v48 = vpop.f32.mrf.mxu1 }
 0x60e   : > { %2290 = vst [vmem:[%s4539_s9 + $0x20] sm:$0xff] %v2240_v59  ;;  %v2251_v31 = vadd.f32 %v2743_v48, %v2625_v1 }
 0x60f   : > { %v2242_v16 = vpop.f32.mrf.mxu1 }
 0x610   : > { %2293 = vst [vmem:[%s4539_s9 + $0x38] sm:$0xff] %v2251_v31  ;;  %v2243_v23 = vadd.f32 %v2625_v1, %v2242_v16 }
 0x612   : > { %2291 = vst [vmem:[%s4539_s9 + $0x28] sm:$0xff] %v2243_v23 }
 0x61d   : > { %v2746_v28 = vpop.f32.mrf.mxu1 }
 0x61e   : > { %v2264_v45 = vadd.f32 %v2746_v28, %v2625_v1 }
 0x61f   : > { %v2255_v8 = vpop.f32.mrf.mxu1 }
 0x620   : > { %2296 = vst [vmem:[%s4539_s9 + $0x50] sm:$0xff] %v2264_v45  ;;  %v2256_v21 = vadd.f32 %v2625_v1, %v2255_v8 }
 0x621   : > { %v2747_v53 = vpop.f32.mrf.mxu1 }
 0x622   : > { %2294 = vst [vmem:[%s4539_s9 + $0x40] sm:$0xff] %v2256_v21  ;;  %v2267_v25 = vadd.f32 %v2747_v53, %v2625_v1 }
 0x623   : > { %v2258_v62 = vpop.f32.mrf.mxu1 }
 0x624   : > { %2297 = vst [vmem:[%s4539_s9 + $0x58] sm:$0xff] %v2267_v25  ;;  %v2259_v24 = vadd.f32 %v2625_v1, %v2258_v62 }
 0x626   : > { %2295 = vst [vmem:[%s4539_s9 + $0x48] sm:$0xff] %v2259_v24 }
 0x669   : > { %v2750_v54 = vpop.f32.mrf.mxu1 }
 0x66a   : > { %v2280_v35 = vadd.f32 %v2750_v54, %v2625_v1 }
 0x66b   : > { %v2271_v40 = vpop.f32.mrf.mxu1 }
 0x66c   : > { %2300 = vst [vmem:[%s4539_s9 + $0x70] sm:$0xff] %v2280_v35  ;;  %v2272_v7 = vadd.f32 %v2625_v1, %v2271_v40 }
 0x66d   : > { %v2751_v36 = vpop.f32.mrf.mxu1 }
 0x66e   : > { %2298 = vst [vmem:[%s4539_s9 + $0x60] sm:$0xff] %v2272_v7  ;;  %v2283_v57 = vadd.f32 %v2751_v36, %v2625_v1 }
 0x66f   : > { %v2274_v38 = vpop.f32.mrf.mxu1 }
 0x670   : > { %2301 = vst [vmem:[%s4539_s9 + $0x78] sm:$0xff] %v2283_v57  ;;  %v2275_v3 = vadd.f32 %v2625_v1, %v2274_v38 }
 0x672   : > { %2299 = vst [vmem:[%s4539_s9 + $0x68] sm:$0xff] %v2275_v3 }
 0x673   : > { %2989 = shalt.err (!%p2986_p3)
}
 0x674   : > { %s2990_s17 = scalar_lea.hbm %s4560_s15, 2048  ;;  %s2994_s6 = scalar_lea.hbm %s4613_s5, 4096 }
 0x675   : > { %p2991_p4 = scmp.ne.s32.totalorder %s4560_s15, %s2990_s17  ;;  %p2995_p9 = scmp.lt.s32.totalorder %s4560_s15, %s4613_s5 }
 0x676   : > { %p2996_p10 = scmp.lt.s32.totalorder %s2994_s6, %s2990_s17 }
 0x677   : > { %p2992_p7 = pnand %p2991_p4, %p3121_p5 }
 0x678   : > { %p2997_p11 = por %p2996_p10, %p2995_p9 }
 0x679   : > { %p2993_p8 = pneg %p2992_p7 }
 0x67b   : > { %p2998_p12 = pnand %p2997_p11, %p2993_p8 }
 0x67d   : > { %3001 = shalt.err (!%p2998_p12)
}
 0x67e   : > { %s3051_s9 = smov 128   ;;  %s3052_s10 = smov 8  }
 0x67f   : > { %2768 = dma.vmem_to_hbm [thread:$0]  (%p3121_p5), %s4562_s11, 2048, %s4560_s15, %s4568_s22, %s3051_s9, %s3051_s9, %s3052_s10  }
 0x680 PF: > { %p2774_p13 = scmp.ge.s32.totalorder %s3036_s21, 2  ;;  %s2331_s13 = sand.u32 1, %s3024_s18  }
 0x681   : > { %s2332_s14 = scalar_lea.sflag [#allocation3], %s2331_s13 }
 0x682   : > { %p2771_p0 = pnand %p2774_p13, %p3125_p6 }
 0x684   : > { %p2772_p1 = pneg %p2771_p0 }
 0x686   : > { %3019 = dma.done.wait (%p2772_p1), %s2332_s14, 2048  }
 0x687   : > { %3021 = vsyncadd (%p2772_p1), %s2332_s14, 4294965248  ;;  %p15_p2 = scmp.ge.s32.totalorder %s3108_s24, 4   ;;  %s4817_s18 = smov %s3028_s19 }
 0x688   : > { %s4818_s19 = smov %s3032_s20  ;;  %s4819_s20 = smov %s3119_s27 }
 0x689   : > { %s4820_s21 = smov %s3108_s24  ;;  %17 = sbr.rel (!%p15_p2) target bundleno = 3 (0x3), region = 78 }
 0x68e   :  { %2337 = vsyncpa [#allocation3], 1 }
 0x68f   :  { %2339 = vsyncpa [#allocation3 + $0x1], 1 }

</bundles_post_ra>
